<compile_context>
chip_gen: v7x
topology: tpu7x:2x2x1
jax: 0.10.0
libtpu: 0.0.40
codegen_flags: <defaults>
</compile_context>

<pallas_src>
import jax
import jax.numpy as jnp
from jax.experimental import pallas as pl
from jax.experimental.pallas import tpu as pltpu

EPS = 1e-12  # torch.nn.functional.normalize default eps


def _round_up(x, m):
    return ((x + m - 1) // m) * m


def image_mlp_kernel(x_ref, w1_ref, b1_ref, w2_ref, b2_ref, o_ref):
    # --- L2 normalize input rows (dim=1) in f32; torch clamps the norm at eps ---
    x = x_ref[...].astype(jnp.float32)
    nsq = jnp.sum(x * x, axis=1, keepdims=True)
    inv = jax.lax.rsqrt(jnp.maximum(nsq, EPS * EPS))  # == 1 / max(||x||, eps)
    xn = (x * inv).astype(jnp.bfloat16)

    # --- fc1 + ReLU (MXU bf16 matmul, f32 accumulation, f32 epilogue) ---
    feat = jnp.dot(xn, w1_ref[...], preferred_element_type=jnp.float32) + b1_ref[...]
    feat = jnp.maximum(feat, 0.0)

    # TODO(synk): nn.Dropout(0.3) is identity in eval mode; training-mode dropout not implemented.

    # --- tohash + tanh (alpha = 1.0); feed MXU in bf16, accumulate f32 ---
    hid = (
        jnp.dot(feat.astype(jnp.bfloat16), w2_ref[...], preferred_element_type=jnp.float32)
        + b2_ref[...]
    )
    out = jnp.tanh(hid)

    # --- final L2 normalize rows (dim=1); padded columns are exactly 0 ---
    nsq2 = jnp.sum(out * out, axis=1, keepdims=True)
    inv2 = jax.lax.rsqrt(jnp.maximum(nsq2, EPS * EPS))
    o_ref[...] = (out * inv2).astype(o_ref.dtype)


def _vmem_estimate(tn, d_in, hidden, h_pad, wbytes=2):
    weights = 2 * (d_in * hidden + hidden * h_pad) * wbytes  # default double-buffered
    io = 2 * tn * (d_in * wbytes + h_pad * 4)                # x / out tiles, double-buffered
    biases = 2 * (hidden + h_pad) * 4
    interm = tn * hidden * (4 + wbytes)                      # f32 feat + bf16 copy
    return weights + io + biases + interm


def image_mlp(x, w1, b1, w2, b2, *, tn=None):
    """x: (N, D_in); w1: (D_in, 4096); b1: (4096,); w2: (4096, H); b2: (H,)."""
    N, D_in = x.shape
    hidden = w1.shape[1]
    H = w2.shape[1]

    # Lane-dense output width (pad hash columns up to a multiple of 128).
    H_pad = _round_up(H, 128)

    # Batch tile: multiple of 16 (bf16 sublane packing); 256 rows once N is large so
    # the grid has several steps and x/out DMAs pipeline against the MXU while the
    # weights stay resident.
    if tn is None:
        tn = 256 if N >= 256 else _round_up(max(N, 16), 16)
    N_pad = _round_up(N, tn)
    grid = (N_pad // tn,)

    out_dtype = x.dtype

    # Cast activations/weights to bf16 at the call boundary; biases stay f32.
    xc = x.astype(jnp.bfloat16)
    if N_pad != N:
        xc = jnp.pad(xc, ((0, N_pad - N), (0, 0)))
    w1c = w1.astype(jnp.bfloat16)
    w2c = w2.astype(jnp.bfloat16)
    b2c = b2.astype(jnp.float32)
    if H_pad != H:
        w2c = jnp.pad(w2c, ((0, 0), (0, H_pad - H)))
        b2c = jnp.pad(b2c, ((0, H_pad - H),))
    b1_2d = b1.astype(jnp.float32).reshape(1, hidden)
    b2_2d = b2c.reshape(1, H_pad)

    # Raise the scoped-VMEM limit only when the tile configuration needs it
    # (cap at 48 MiB so the request is valid on v5e/v6e and v7x's 64 MiB VMEM).
    est = _vmem_estimate(tn, D_in, hidden, H_pad)
    vmem_limit = None
    if est > 12 * 1024 * 1024:
        vmem_limit = min(int(est * 1.5), 48 * 1024 * 1024)

    out = pl.pallas_call(
        image_mlp_kernel,
        out_shape=jax.ShapeDtypeStruct((N_pad, H_pad), out_dtype),
        grid_spec=pltpu.PrefetchScalarGridSpec(
            num_scalar_prefetch=0,
            grid=grid,
            in_specs=[
                pl.BlockSpec((tn, D_in), lambda i: (i, 0)),       # x tile (pipelined)
                pl.BlockSpec((D_in, hidden), lambda i: (0, 0)),   # w1 (resident)
                pl.BlockSpec((1, hidden), lambda i: (0, 0)),      # b1 (resident)
                pl.BlockSpec((hidden, H_pad), lambda i: (0, 0)),  # w2 (resident)
                pl.BlockSpec((1, H_pad), lambda i: (0, 0)),       # b2 (resident)
            ],
            out_specs=pl.BlockSpec((tn, H_pad), lambda i: (i, 0)),
        ),
        compiler_params=pltpu.CompilerParams(
            dimension_semantics=("parallel",),
            vmem_limit_bytes=vmem_limit,
        ),
    )(xc, w1c, b1_2d, w2c, b2_2d)

    # Strip batch/hash padding.
    return out[:N, :H]


def image_mlp_ref(x, w1, b1, w2, b2):
    """Pure-JAX f32 reference matching the PyTorch forward (eval mode)."""
    xn = x / jnp.maximum(jnp.linalg.norm(x, axis=1, keepdims=True), EPS)
    feat = jnp.maximum(xn @ w1 + b1, 0.0)
    out = jnp.tanh(feat @ w2 + b2)
    return out / jnp.maximum(jnp.linalg.norm(out, axis=1, keepdims=True), EPS)


if __name__ == "__main__":
    key = jax.random.PRNGKey(0)
    k_x, k_w1, k_b1, k_w2, k_b2 = jax.random.split(key, 5)

    # Small, module-consistent shapes: batch=8, input_dim=128, hidden=4096, hash_lens=64
    N, D_in, hidden, hash_lens = 8, 128, 4096, 64

    x = jax.random.normal(k_x, (N, D_in), dtype=jnp.float32)

    # Deterministic synthetic parameters (PyTorch-like uniform fan-in scaling)
    bound1 = 1.0 / (D_in ** 0.5)
    w1 = jax.random.uniform(k_w1, (D_in, hidden), jnp.float32, -bound1, bound1)
    b1 = jax.random.uniform(k_b1, (hidden,), jnp.float32, -bound1, bound1)
    bound2 = 1.0 / (hidden ** 0.5)
    w2 = jax.random.uniform(k_w2, (hidden, hash_lens), jnp.float32, -bound2, bound2)
    b2 = jax.random.uniform(k_b2, (hash_lens,), jnp.float32, -bound2, bound2)

    out = image_mlp(x, w1, b1, w2, b2)
    out = jax.block_until_ready(out)

    ref = image_mlp_ref(x, w1, b1, w2, b2)
    assert out.shape == (N, hash_lens)
    # bf16 inputs/weights with f32 accumulation: loosen tolerance vs the f32 reference.
    assert jnp.allclose(out, ref, atol=2e-2, rtol=2e-2), "mismatch vs reference"

    print("KERNEL_OK")
</pallas_src>

<mosaic_0001>
module attributes {stable_mosaic.version = 11 : i64} {
  func.func @image_mlp_kernel(%arg0: i32, %arg1: memref<16x128xbf16, #tpu.memory_space<vmem>>, %arg2: memref<128x4096xbf16, #tpu.memory_space<vmem>>, %arg3: memref<1x4096xf32, #tpu.memory_space<vmem>>, %arg4: memref<4096x128xbf16, #tpu.memory_space<vmem>>, %arg5: memref<1x128xf32, #tpu.memory_space<vmem>>, %arg6: memref<16x128xf32, #tpu.memory_space<vmem>>) attributes {dimension_semantics = [#tpu.dimension_semantics<parallel>], iteration_bounds = array<i64: 1>, scalar_prefetch = 0 : i64, scratch_operands = 0 : i64, tpu.core_type = #tpu.core_type<tc>, window_params = [{transform_indices = @transform_0, window_bounds = array<i64: 16, 128>}, {pipeline_mode = #tpu.pipeline_mode<synchronous>, transform_indices = @transform_1, window_bounds = array<i64: 128, 4096>}, {pipeline_mode = #tpu.pipeline_mode<synchronous>, transform_indices = @transform_2, window_bounds = array<i64: 1, 4096>}, {pipeline_mode = #tpu.pipeline_mode<synchronous>, transform_indices = @transform_3, window_bounds = array<i64: 4096, 128>}, {pipeline_mode = #tpu.pipeline_mode<synchronous>, transform_indices = @transform_4, window_bounds = array<i64: 1, 128>}, {transform_indices = @transform_5, window_bounds = array<i64: 16, 128>}]} {
    %c0 = arith.constant 0 : index
    %c0_0 = arith.constant 0 : index
    %0 = vector.load %arg1[%c0, %c0_0] : memref<16x128xbf16, #tpu.memory_space<vmem>>, vector<16x128xbf16>
    %1 = arith.extf %0 : vector<16x128xbf16> to vector<16x128xf32>
    %2 = arith.mulf %1, %1 : vector<16x128xf32>
    %cst = arith.constant dense<0.000000e+00> : vector<16xf32>
    %3 = vector.multi_reduction <add>, %2, %cst [1] : vector<16x128xf32> to vector<16xf32>
    %4 = vector.shape_cast %3 : vector<16xf32> to vector<16x1xf32>
    %cst_1 = arith.constant 1.000000e-24 : f32
    %5 = vector.broadcast %cst_1 : f32 to vector<16x1xf32>
    %6 = arith.maximumf %4, %5 : vector<16x1xf32>
    %7 = math.rsqrt %6 : vector<16x1xf32>
    %8 = vector.broadcast %7 : vector<16x1xf32> to vector<16x128xf32>
    %9 = arith.mulf %1, %8 : vector<16x128xf32>
    %10 = arith.truncf %9 : vector<16x128xf32> to vector<16x128xbf16>
    %c0_2 = arith.constant 0 : index
    %c0_3 = arith.constant 0 : index
    %11 = vector.load %arg2[%c0_2, %c0_3] : memref<128x4096xbf16, #tpu.memory_space<vmem>>, vector<128x4096xbf16>
    %cst_4 = arith.constant dense<0.000000e+00> : vector<16x4096xf32>
    %12 = tpu.matmul %10, %11, %cst_4 {dimension_numbers = #tpu.dot_dimension_numbers<[1], [0], [0], [1], [0, 0, 1, 1], [], []>} : vector<16x128xbf16>, vector<128x4096xbf16>, vector<16x4096xf32> -> vector<16x4096xf32>
    %c0_5 = arith.constant 0 : index
    %c0_6 = arith.constant 0 : index
    %13 = vector.load %arg3[%c0_5, %c0_6] : memref<1x4096xf32, #tpu.memory_space<vmem>>, vector<1x4096xf32>
    %14 = vector.broadcast %13 : vector<1x4096xf32> to vector<16x4096xf32>
    %15 = arith.addf %12, %14 : vector<16x4096xf32>
    %cst_7 = arith.constant 0.000000e+00 : f32
    %16 = vector.broadcast %cst_7 : f32 to vector<16x4096xf32>
    %17 = arith.maximumf %15, %16 : vector<16x4096xf32>
    %18 = arith.truncf %17 : vector<16x4096xf32> to vector<16x4096xbf16>
    %c0_8 = arith.constant 0 : index
    %c0_9 = arith.constant 0 : index
    %19 = vector.load %arg4[%c0_8, %c0_9] : memref<4096x128xbf16, #tpu.memory_space<vmem>>, vector<4096x128xbf16>
    %cst_10 = arith.constant dense<0.000000e+00> : vector<16x128xf32>
    %20 = tpu.matmul %18, %19, %cst_10 {dimension_numbers = #tpu.dot_dimension_numbers<[1], [0], [0], [1], [0, 0, 1, 1], [], []>} : vector<16x4096xbf16>, vector<4096x128xbf16>, vector<16x128xf32> -> vector<16x128xf32>
    %c0_11 = arith.constant 0 : index
    %c0_12 = arith.constant 0 : index
    %21 = vector.load %arg5[%c0_11, %c0_12] : memref<1x128xf32, #tpu.memory_space<vmem>>, vector<1x128xf32>
    %22 = vector.broadcast %21 : vector<1x128xf32> to vector<16x128xf32>
    %23 = arith.addf %20, %22 : vector<16x128xf32>
    %24 = math.tanh %23 : vector<16x128xf32>
    %25 = arith.mulf %24, %24 : vector<16x128xf32>
    %cst_13 = arith.constant dense<0.000000e+00> : vector<16xf32>
    %26 = vector.multi_reduction <add>, %25, %cst_13 [1] : vector<16x128xf32> to vector<16xf32>
    %27 = vector.shape_cast %26 : vector<16xf32> to vector<16x1xf32>
    %cst_14 = arith.constant 1.000000e-24 : f32
    %28 = vector.broadcast %cst_14 : f32 to vector<16x1xf32>
    %29 = arith.maximumf %27, %28 : vector<16x1xf32>
    %30 = math.rsqrt %29 : vector<16x1xf32>
    %31 = vector.broadcast %30 : vector<16x1xf32> to vector<16x128xf32>
    %32 = arith.mulf %24, %31 : vector<16x128xf32>
    %c0_15 = arith.constant 0 : index
    %c0_16 = arith.constant 0 : index
    %33 = vector.load %arg6[%c0_15, %c0_16] : memref<16x128xf32, #tpu.memory_space<vmem>>, vector<16x128xf32>
    tpu.vector_store %arg6[%c0_15, %c0_16], %32 {strides = array<i32>} : memref<16x128xf32, #tpu.memory_space<vmem>>, vector<16x128xf32>,
    return
  }
  func.func @transform_0(%arg0: i32) -> (i32, i32) {
    %c0_i32 = arith.constant 0 : i32
    %c0_i32_0 = arith.constant 0 : i32
    return %arg0, %c0_i32 : i32, i32
  }
  func.func @transform_1(%arg0: i32) -> (i32, i32) {
    %c0_i32 = arith.constant 0 : i32
    %c0_i32_0 = arith.constant 0 : i32
    %c0_i32_1 = arith.constant 0 : i32
    return %c0_i32, %c0_i32_0 : i32, i32
  }
  func.func @transform_2(%arg0: i32) -> (i32, i32) {
    %c0_i32 = arith.constant 0 : i32
    %c0_i32_0 = arith.constant 0 : i32
    %c0_i32_1 = arith.constant 0 : i32
    return %c0_i32, %c0_i32_0 : i32, i32
  }
  func.func @transform_3(%arg0: i32) -> (i32, i32) {
    %c0_i32 = arith.constant 0 : i32
    %c0_i32_0 = arith.constant 0 : i32
    %c0_i32_1 = arith.constant 0 : i32
    return %c0_i32, %c0_i32_0 : i32, i32
  }
  func.func @transform_4(%arg0: i32) -> (i32, i32) {
    %c0_i32 = arith.constant 0 : i32
    %c0_i32_0 = arith.constant 0 : i32
    %c0_i32_1 = arith.constant 0 : i32
    return %c0_i32, %c0_i32_0 : i32, i32
  }
  func.func @transform_5(%arg0: i32) -> (i32, i32) {
    %c0_i32 = arith.constant 0 : i32
    %c0_i32_0 = arith.constant 0 : i32
    return %arg0, %c0_i32 : i32, i32
  }
}

</mosaic_0001>

<bundles_post_ra>
// kernel: tpu_custom_call.1
= control target key start
LH: loop header
LB: loop body
LE: loop exit
PB: predicated region body
PF: predicated region fallthrough
CT: control target
= control target key end

     0   :  { %10 = vsyncpa [#allocation3], 0  ;;  %s6902_s0 = inlined_call_operand.hbm [shape: bf16[16,128], index: 0, kind: input, shape index: {}]   ;;  %s6903_s1 = inlined_call_operand.hbm [shape: bf16[128,4096], index: 1, kind: input, shape index: {}]   ;;  %s6904_s2 = inlined_call_operand.hbm [shape: f32[1,4096], index: 2, kind: input, shape index: {}]   ;;  %s6905_s3 = inlined_call_operand.hbm [shape: bf16[4096,128], index: 3, kind: input, shape index: {}]   ;;  %s6906_s4 = inlined_call_operand.vmem [shape: f32[1,128], index: 4, kind: input, shape index: {}]   ;;  %s6907_s5 = inlined_call_operand.hbm [shape: f32[16,128], index: 5, kind: output, shape index: {}]  }
   0x1   :  { %11 = vsyncpa [#allocation6], 0 }
   0x2   :  { %12 = vsyncpa [#allocation9], 0 }
   0x3   :  { %13 = vsyncpa [#allocation4], 0  ;;  %s6592_s18 = smov [#allocation5]   ;;  %s6474_s22 = scalar_lea.hbm %s6903_s1, 32768 }
   0x4   :  { %s31_s19 = sshll.u32 %s6592_s18, 4  ;;  %p6475_p0 = scmp.ne.s32.totalorder %s6903_s1, %s6474_s22  ;;  %s32_s19 = int_to_ptr.vmem [resolvable:$true] %s31_s19 }
   0x5   :  { %p6478_p1 = scmp.lt.u32.totalorder %s6474_s22, %s6903_s1 }
   0x7   :  { %p6480_p2 = pnand %p6478_p1, %p6475_p0 }
   0x9   :  { %6483 = shalt.err (!%p6480_p2)
}
   0xa   :  { %s6484_s27 = scalar_lea.vmem %s32_s19, 32768  ;;  %p6489_p4 = scmp.lt.s32.totalorder %s32_s19, %s32_s19 }
   0xb   :  { %p6485_p3 = scmp.ne.s32.totalorder %s32_s19, %s6484_s27  ;;  %p6490_p5 = scmp.lt.s32.totalorder %s6484_s27, %s6484_s27 }
   0xd   :  { %p6491_p6 = por %p6490_p5, %p6489_p4 }
   0xf   :  { %p6492_p7 = pnand %p6491_p6, %p6485_p3 }
  0x11   :  { %6495 = shalt.err (!%p6492_p7)
}
  0x12   :  { %s6593_s28 = smov 2048   ;;  %s6594_s29 = smov 128  }
  0x13   :  { %37 = dma.hbm_to_vmem [thread:$0]  %s6903_s1, 32768, %s32_s19, [#allocation6], %s6593_s28, %s6593_s28, %s6594_s29  }
  0x14   :  { %s6595_s7 = smov [#allocation2]   ;;  %s6496_s11 = scalar_lea.hbm %s6902_s0, 128 }
  0x15   :  { %s19_s8 = sshll.u32 %s6595_s7, 4  ;;  %p6497_p8 = scmp.ne.s32.totalorder %s6902_s0, %s6496_s11  ;;  %s20_s8 = int_to_ptr.vmem [resolvable:$true] %s19_s8 }
  0x16   :  { %p6500_p9 = scmp.lt.u32.totalorder %s6496_s11, %s6902_s0 }
  0x18   :  { %p6502_p10 = pnand %p6500_p9, %p6497_p8 }
  0x1a   :  { %6505 = shalt.err (!%p6502_p10)
}
  0x1b   :  { %s6506_s16 = scalar_lea.vmem %s20_s8, 128  ;;  %p6511_p12 = scmp.lt.s32.totalorder %s20_s8, %s20_s8 }
  0x1c   :  { %p6507_p11 = scmp.ne.s32.totalorder %s20_s8, %s6506_s16  ;;  %p6512_p13 = scmp.lt.s32.totalorder %s6506_s16, %s6506_s16 }
  0x1e   :  { %p6513_p0 = por %p6512_p13, %p6511_p12 }
  0x20   :  { %p6514_p1 = pnand %p6513_p0, %p6507_p11 }
  0x22   :  { %6517 = shalt.err (!%p6514_p1)
}
  0x23   :  { %s6596_s1 = smov 64   ;;  %s6597_s17 = smov 4  }
  0x24   :  { %25 = dma.hbm_to_vmem [thread:$0]  %s6902_s0, 128, %s20_s8, [#allocation3], %s6596_s1, %s6596_s1, %s6597_s17  }
  0x25   :  { %s6598_s20 = smov [#allocation7]   ;;  %s6599_s22 = smov [#allocation8]  }
  0x26   :  { %s44_s21 = sshll.u32 %s6598_s20, 4  ;;  %s53_s23 = sshll.u32 %s6599_s22, 4  ;;  %s45_s21 = int_to_ptr.vmem [resolvable:$true] %s44_s21  ;;  %s6661_s23 = int_to_ptr.vmem [resolvable:$true] %s53_s23 }
  0x27   :  { %s6518_s26 = scalar_lea.hbm %s6904_s2, 512 }
  0x28   :  { %p6519_p2 = scmp.ne.s32.totalorder %s6904_s2, %s6518_s26  ;;  %p6522_p3 = scmp.lt.u32.totalorder %s6518_s26, %s6904_s2 }
  0x2a   :  { %p6524_p4 = pnand %p6522_p3, %p6519_p2 }
  0x2c   :  { %6527 = shalt.err (!%p6524_p4)
}
  0x2d   :  { %s6528_s0 = scalar_lea.vmem %s45_s21, 512  ;;  %p6533_p6 = scmp.lt.s32.totalorder %s45_s21, %s45_s21 }
  0x2e   :  { %p6529_p5 = scmp.ne.s32.totalorder %s45_s21, %s6528_s0  ;;  %p6534_p7 = scmp.lt.s32.totalorder %s6528_s0, %s6528_s0 }
  0x30   :  { %p6535_p8 = por %p6534_p7, %p6533_p6 }
  0x32   :  { %p6536_p9 = pnand %p6535_p8, %p6529_p5 }
  0x34   :  { %6539 = shalt.err (!%p6536_p9)
}
  0x35   :  { %47 = dma.hbm_to_vmem [thread:$0]  %s6904_s2, 512, %s45_s21, [#allocation6]  }
  0x36   :  { %s6540_s11 = scalar_lea.hbm %s6905_s3, 32768 }
  0x37   :  { %p6541_p10 = scmp.ne.s32.totalorder %s6905_s3, %s6540_s11  ;;  %p6544_p11 = scmp.lt.u32.totalorder %s6540_s11, %s6905_s3 }
  0x39   :  { %p6546_p12 = pnand %p6544_p11, %p6541_p10 }
  0x3b   :  { %6549 = shalt.err (!%p6546_p12)
}
  0x3c   :  { %s6550_s16 = scalar_lea.vmem %s6661_s23, 32768  ;;  %p6555_p0 = scmp.lt.s32.totalorder %s6661_s23, %s6661_s23 }
  0x3d   :  { %p6551_p13 = scmp.ne.s32.totalorder %s6661_s23, %s6550_s16  ;;  %p6556_p1 = scmp.lt.s32.totalorder %s6550_s16, %s6550_s16 }
  0x3f   :  { %p6557_p2 = por %p6556_p1, %p6555_p0 }
  0x41   :  { %p6558_p3 = pnand %p6557_p2, %p6551_p13 }
  0x43   :  { %6561 = shalt.err (!%p6558_p3)
}
  0x44   :  { %59 = dma.hbm_to_vmem [thread:$0]  %s6905_s3, 32768, %s6661_s23, [#allocation9], %s6596_s1, %s6596_s1, %s6597_s17  }
  0x45   :  { %6584 = dma.done.wait [#allocation3], 128  }
  0x46   :  { %6585 = vsyncadd [#allocation3], 4294967168 }
  0x47   :  { %6586 = dma.done.wait [#allocation6], 33280  }
  0x48   :  { %6587 = vsyncadd [#allocation6], 4294934016 }
  0x49   :  { %6588 = dma.done.wait [#allocation9], 32768  }
  0x4a   :  { %6589 = vsyncadd [#allocation9], 4294934528  ;;  %v5840_v0 = vld [vmem:[#allocation2] sm:$0xff]   ;;  %v92_v1 = vld [vmem:[#allocation5] sm:$0xff] }
  0x4b   :  { %v108_v2 = vld [vmem:[#allocation5 + $0x80] sm:$0xff]  ;;  %v6695_v3 = vunpack.c.l.bf16 %v5840_v0  ;;  %v6697_v4 = vunpack.c.h.bf16 %v5840_v0  ;;  %v93_v6 = vld [vmem:[#allocation5 + $0x8] sm:$0xff] }
  0x4c   :  { %v5327_v5 = vcombine.high %v92_v1, %v108_v2  ;;  %v109_v7 = vld [vmem:[#allocation5 + $0x88] sm:$0xff]  ;;  %v5326_v8 = vcombine.low %v92_v1, %v108_v2  ;;  %v124_v9 = vld [vmem:[#allocation5 + $0x100] sm:$0xff] }
  0x4d   :  { %v5329_v10 = vcombine.high %v93_v6, %v109_v7  ;;  %v5328_v11 = vcombine.low %v93_v6, %v109_v7  ;;  %v140_v12 = vld [vmem:[#allocation5 + $0x180] sm:$0xff]  ;;  %v125_v13 = vld [vmem:[#allocation5 + $0x108] sm:$0xff]  ;;  %v79_v15 = vmul.f32 %v6695_v3, %v6695_v3  ;;  %v80_v23 = vmul.f32 %v6697_v4, %v6697_v4  ;;  %v94_v7 = vld [vmem:[#allocation5 + $0x10] sm:$0xff] }
  0x4e   :  { %v141_v14 = vld [vmem:[#allocation5 + $0x188] sm:$0xff]  ;;  %1796 = vmatprep.subr.bf16.mxu0 %v5327_v5  ;;  %v5359_v16 = vcombine.high %v124_v9, %v140_v12  ;;  %v156_v18 = vld [vmem:[#allocation5 + $0x200] sm:$0xff]  ;;  %v5358_v21 = vcombine.low %v124_v9, %v140_v12  ;;  %v95_v9 = vld [vmem:[#allocation5 + $0x18] sm:$0xff] }
  0x4f   :  { %v5361_v17 = vcombine.high %v125_v13, %v141_v14  ;;  %v172_v19 = vld [vmem:[#allocation5 + $0x280] sm:$0xff]  ;;  %v157_v20 = vld [vmem:[#allocation5 + $0x208] sm:$0xff]  ;;  %1839 = vmatprep.subr.bf16.mxu1 %v5329_v10  ;;  %1797 = vmatpush1.bf16.msra.mxu0 %v5326_v8  ;;  %v5360_v24 = vcombine.low %v125_v13, %v141_v14  ;;  %v110_v8 = vld [vmem:[#allocation5 + $0x90] sm:$0xff] }
  0x50   :  { %v173_v22 = vld [vmem:[#allocation5 + $0x288] sm:$0xff]  ;;  %81 = vadd.xlane.f32.xlu0 %v79_v15  ;;  %1840 = vmatpush1.bf16.msra.mxu1 %v5328_v11  ;;  %v5391_v25 = vcombine.high %v156_v18, %v172_v19  ;;  %v5390_v27 = vcombine.low %v156_v18, %v172_v19  ;;  %v188_v29 = vld [vmem:[#allocation5 + $0x300] sm:$0xff]  ;;  %v5331_v10 = vcombine.high %v94_v7, %v110_v8  ;;  %v111_v11 = vld [vmem:[#allocation5 + $0x98] sm:$0xff]  ;;  %v6600_v15 = vmov 0  }
  0x51   :  { %1798 = vmatprep.subr.bf16.mxu0 %v5359_v16  ;;  %1841 = vmatprep.subr.bf16.mxu1 %v5361_v17  ;;  %v5393_v26 = vcombine.high %v157_v20, %v173_v22  ;;  %v5392_v28 = vcombine.low %v157_v20, %v173_v22  ;;  %v204_v30 = vld [vmem:[#allocation5 + $0x380] sm:$0xff]  ;;  %v189_v31 = vld [vmem:[#allocation5 + $0x308] sm:$0xff]  ;;  %v5330_v12 = vcombine.low %v94_v7, %v110_v8  ;;  %v142_v22 = vld [vmem:[#allocation5 + $0x190] sm:$0xff] }
  0x52   :  { %v5423_v32 = vcombine.high %v188_v29, %v204_v30  ;;  %v205_v33 = vld [vmem:[#allocation5 + $0x388] sm:$0xff]  ;;  %v5422_v35 = vcombine.low %v188_v29, %v204_v30  ;;  %v220_v37 = vld [vmem:[#allocation5 + $0x400] sm:$0xff]  ;;  %v5332_v13 = vcombine.low %v95_v9, %v111_v11  ;;  %v5333_v14 = vcombine.high %v95_v9, %v111_v11  ;;  %1828 = vmatprep.mubr.bf16.mxu0 %v6600_v15  ;;  %v174_v29 = vld [vmem:[#allocation5 + $0x290] sm:$0xff] }
  0x53   :  { %1799 = vmatpush1.bf16.msra.mxu0 %v5358_v21  ;;  %v5425_v34 = vcombine.high %v189_v31, %v205_v33  ;;  %v5424_v36 = vcombine.low %v189_v31, %v205_v33  ;;  %v236_v38 = vld [vmem:[#allocation5 + $0x480] sm:$0xff]  ;;  %v221_v39 = vld [vmem:[#allocation5 + $0x408] sm:$0xff]  ;;  %1871 = vmatprep.mubr.bf16.mxu1 %v6600_v15  ;;  %v126_v21 = vld [vmem:[#allocation5 + $0x110] sm:$0xff] }
  0x54   :  { %83 = vadd.xlane.f32.xlu0 %v80_v23  ;;  %1842 = vmatpush1.bf16.msra.mxu1 %v5360_v24  ;;  %v5455_v40 = vcombine.high %v220_v37, %v236_v38  ;;  %v237_v41 = vld [vmem:[#allocation5 + $0x488] sm:$0xff]  ;;  %v5454_v43 = vcombine.low %v220_v37, %v236_v38  ;;  %v252_v45 = vld [vmem:[#allocation5 + $0x500] sm:$0xff]  ;;  %v127_v23 = vld [vmem:[#allocation5 + $0x118] sm:$0xff] }
  0x55   :  { %1800 = vmatprep.subr.bf16.mxu0 %v5391_v25  ;;  %1843 = vmatprep.subr.bf16.mxu1 %v5393_v26  ;;  %v5457_v42 = vcombine.high %v221_v39, %v237_v41  ;;  %v5456_v44 = vcombine.low %v221_v39, %v237_v41  ;;  %v268_v46 = vld [vmem:[#allocation5 + $0x580] sm:$0xff]  ;;  %v253_v47 = vld [vmem:[#allocation5 + $0x508] sm:$0xff]  ;;  %v143_v24 = vld [vmem:[#allocation5 + $0x198] sm:$0xff] }
  0x56   :  { %v5487_v48 = vcombine.high %v252_v45, %v268_v46  ;;  %v269_v49 = vld [vmem:[#allocation5 + $0x588] sm:$0xff]  ;;  %v5486_v51 = vcombine.low %v252_v45, %v268_v46  ;;  %v284_v53 = vld [vmem:[#allocation5 + $0x600] sm:$0xff]  ;;  %v159_v30 = vld [vmem:[#allocation5 + $0x218] sm:$0xff]  ;;  %v5365_v33 = vcombine.high %v127_v23, %v143_v24 }
  0x57   :  { %1801 = vmatpush1.bf16.msra.mxu0 %v5390_v27  ;;  %v5489_v50 = vcombine.high %v253_v47, %v269_v49  ;;  %v5488_v52 = vcombine.low %v253_v47, %v269_v49  ;;  %v300_v54 = vld [vmem:[#allocation5 + $0x680] sm:$0xff]  ;;  %v285_v55 = vld [vmem:[#allocation5 + $0x608] sm:$0xff]  ;;  %v190_v37 = vld [vmem:[#allocation5 + $0x310] sm:$0xff] }
  0x58   :  { %1844 = vmatpush1.bf16.msra.mxu1 %v5392_v28  ;;  %1802 = vmatprep.subr.bf16.mxu0 %v5423_v32  ;;  %v5519_v56 = vcombine.high %v284_v53, %v300_v54  ;;  %v301_v57 = vld [vmem:[#allocation5 + $0x688] sm:$0xff]  ;;  %v5518_v59 = vcombine.low %v284_v53, %v300_v54  ;;  %v316_v61 = vld [vmem:[#allocation5 + $0x700] sm:$0xff]  ;;  %v158_v28 = vld [vmem:[#allocation5 + $0x210] sm:$0xff]  ;;  %v5363_v32 = vcombine.high %v126_v21, %v142_v22 }
  0x59   :  { %1845 = vmatprep.subr.bf16.mxu1 %v5425_v34  ;;  %v5521_v58 = vcombine.high %v285_v55, %v301_v57  ;;  %v5520_v60 = vcombine.low %v285_v55, %v301_v57  ;;  %v332_v62 = vld [vmem:[#allocation5 + $0x780] sm:$0xff]  ;;  %v317_v63 = vld [vmem:[#allocation5 + $0x708] sm:$0xff]  ;;  %v175_v34 = vld [vmem:[#allocation5 + $0x298] sm:$0xff]  ;;  %v5394_v41 = vcombine.low %v158_v28, %v174_v29 }
  0x5a   :  { %v5551_v0 = vcombine.high %v316_v61, %v332_v62  ;;  %v333_v1 = vld [vmem:[#allocation5 + $0x788] sm:$0xff]  ;;  %v5550_v5 = vcombine.low %v316_v61, %v332_v62  ;;  %v191_v38 = vld [vmem:[#allocation5 + $0x318] sm:$0xff]  ;;  %v5397_v39 = vcombine.high %v159_v30, %v175_v34 }
  0x5b   :  { %1803 = vmatpush1.bf16.msra.mxu0 %v5422_v35  ;;  %v5553_v2 = vcombine.high %v317_v63, %v333_v1  ;;  %v5552_v6 = vcombine.low %v317_v63, %v333_v1  ;;  %v5362_v35 = vcombine.low %v126_v21, %v142_v22  ;;  %v223_v45 = vld [vmem:[#allocation5 + $0x418] sm:$0xff]  ;;  %v128_v22 = vld [vmem:[#allocation5 + $0x120] sm:$0xff] }
  0x5c   :  { %1846 = vmatpush1.bf16.msra.mxu1 %v5424_v36  ;;  %1804 = vmatprep.subr.bf16.mxu0 %v5455_v40  ;;  %v5364_v36 = vcombine.low %v127_v23, %v143_v24  ;;  %v207_v40 = vld [vmem:[#allocation5 + $0x398] sm:$0xff]  ;;  %v144_v23 = vld [vmem:[#allocation5 + $0x1a0] sm:$0xff]  ;;  %v129_v24 = vld [vmem:[#allocation5 + $0x128] sm:$0xff] }
  0x5d   :  { %1847 = vmatprep.subr.bf16.mxu1 %v5457_v42  ;;  %v5396_v42 = vcombine.low %v159_v30, %v175_v34  ;;  %v5429_v47 = vcombine.high %v191_v38, %v207_v40  ;;  %v255_v53 = vld [vmem:[#allocation5 + $0x518] sm:$0xff]  ;;  %v160_v30 = vld [vmem:[#allocation5 + $0x220] sm:$0xff]  ;;  %v5367_v34 = vcombine.high %v128_v22, %v144_v23 }
  0x5e   :  { %v287_v61 = vld [vmem:[#allocation5 + $0x618] sm:$0xff] }
  0x5f   :  { %1805 = vmatpush1.bf16.msra.mxu0 %v5454_v43  ;;  %v222_v43 = vld [vmem:[#allocation5 + $0x410] sm:$0xff]  ;;  %v319_v7 = vld [vmem:[#allocation5 + $0x718] sm:$0xff] }
  0x60   :  { %1848 = vmatpush1.bf16.msra.mxu1 %v5456_v44  ;;  %1806 = vmatprep.subr.bf16.mxu0 %v5487_v48  ;;  %v238_v44 = vld [vmem:[#allocation5 + $0x490] sm:$0xff]  ;;  %v239_v48 = vld [vmem:[#allocation5 + $0x498] sm:$0xff] }
  0x61   :  { %1849 = vmatprep.subr.bf16.mxu1 %v5489_v50  ;;  %v5428_v50 = vcombine.low %v191_v38, %v207_v40  ;;  %v5459_v54 = vcombine.high %v222_v43, %v238_v44  ;;  %v5461_v55 = vcombine.high %v223_v45, %v239_v48  ;;  %v5458_v57 = vcombine.low %v222_v43, %v238_v44  ;;  %v192_v38 = vld [vmem:[#allocation5 + $0x320] sm:$0xff] }
  0x63   :  { %1807 = vmatpush1.bf16.msra.mxu0 %v5486_v51  ;;  %v254_v51 = vld [vmem:[#allocation5 + $0x510] sm:$0xff] }
  0x64   :  { %1850 = vmatpush1.bf16.msra.mxu1 %v5488_v52  ;;  %1808 = vmatprep.subr.bf16.mxu0 %v5519_v56  ;;  %v270_v52 = vld [vmem:[#allocation5 + $0x590] sm:$0xff]  ;;  %v271_v56 = vld [vmem:[#allocation5 + $0x598] sm:$0xff] }
  0x65   :  { %1851 = vmatprep.subr.bf16.mxu1 %v5521_v58  ;;  %v5460_v58 = vcombine.low %v223_v45, %v239_v48  ;;  %v5491_v62 = vcombine.high %v254_v51, %v270_v52  ;;  %v5493_v63 = vcombine.high %v255_v53, %v271_v56  ;;  %v5490_v1 = vcombine.low %v254_v51, %v270_v52  ;;  %v224_v45 = vld [vmem:[#allocation5 + $0x420] sm:$0xff] }
  0x67   :  { %1809 = vmatpush1.bf16.msra.mxu0 %v5518_v59  ;;  %v286_v59 = vld [vmem:[#allocation5 + $0x610] sm:$0xff] }
  0x68   :  { %1852 = vmatpush1.bf16.msra.mxu1 %v5520_v60  ;;  %1810 = vmatprep.subr.bf16.mxu0 %v5551_v0  ;;  %v302_v60 = vld [vmem:[#allocation5 + $0x690] sm:$0xff]  ;;  %v303_v0 = vld [vmem:[#allocation5 + $0x698] sm:$0xff] }
  0x69   :  { %1853 = vmatprep.subr.bf16.mxu1 %v5553_v2  ;;  %v5492_v2 = vcombine.low %v255_v53, %v271_v56  ;;  %v5523_v8 = vcombine.high %v286_v59, %v302_v60  ;;  %v5525_v9 = vcombine.high %v287_v61, %v303_v0  ;;  %v5522_v11 = vcombine.low %v286_v59, %v302_v60  ;;  %v256_v53 = vld [vmem:[#allocation5 + $0x520] sm:$0xff] }
  0x6b   :  { %1811 = vmatpush1.bf16.msra.mxu0 %v5550_v5  ;;  %v318_v5 = vld [vmem:[#allocation5 + $0x710] sm:$0xff] }
  0x6c   :  { %1854 = vmatpush1.bf16.msra.mxu1 %v5552_v6  ;;  %1882 = vmatprep.subr.bf16.mxu0 %v5331_v10  ;;  %v334_v6 = vld [vmem:[#allocation5 + $0x790] sm:$0xff]  ;;  %v335_v10 = vld [vmem:[#allocation5 + $0x798] sm:$0xff] }
  0x6d   :  { %1925 = vmatprep.subr.bf16.mxu1 %v5333_v14  ;;  %v112_v14 = vld [vmem:[#allocation5 + $0xa0] sm:$0xff]  ;;  %v5556_v21 = vcombine.low %v319_v7, %v335_v10 }
  0xdd   :  { %v82_v16 = vpop.xlane.xlu0 %81 }
  0xde   :  { %v85_v17 = vmax.f32 %v82_v16, 1e-24  ;;  %v97_v16 = vld [vmem:[#allocation5 + $0x28] sm:$0xff] }
  0xe0   :  { %6462 = vrsqrt.f32 %v85_v17  ;;  %v5555_v17 = vcombine.high %v318_v5, %v334_v6 }
  0xe1   :  { %v84_v18 = vpop.xlane.xlu0 %83 }
  0xe2   :  { %v86_v19 = vmax.f32 %v84_v18, 1e-24  ;;  %v5557_v18 = vcombine.high %v319_v7, %v335_v10  ;;  %v320_v7 = vld [vmem:[#allocation5 + $0x720] sm:$0xff] }
  0xe4   :  { %6464 = vrsqrt.f32 %v86_v19  ;;  %v113_v19 = vld [vmem:[#allocation5 + $0xa8] sm:$0xff] }
  0xea   :  { %v6463_v20 = vpop.eup %6462 }
  0xeb   :  { %v89_v26 = vmul.f32 %v6463_v20, %v6695_v3  ;;  %v206_v3 = vld [vmem:[#allocation5 + $0x390] sm:$0xff]  ;;  %v5554_v20 = vcombine.low %v318_v5, %v334_v6 }
  0xec   :  { %v5427_v46 = vcombine.high %v190_v37, %v206_v3  ;;  %v5426_v49 = vcombine.low %v190_v37, %v206_v3  ;;  %v5366_v37 = vcombine.low %v128_v22, %v144_v23 }
  0xee   :  { %v6465_v25 = vpop.eup %6464 }
  0xef   :  { %v90_v27 = vmul.f32 %v6465_v25, %v6697_v4  ;;  %v5395_v4 = vcombine.high %v158_v28, %v174_v29  ;;  %v5336_v29 = vcombine.low %v97_v16, %v113_v19 }
  0xf1   :  { %v6707_v31 = vpack.c.bf16 %v90_v27, %v89_v26  ;;  %v5337_v26 = vcombine.high %v97_v16, %v113_v19  ;;  %v145_v27 = vld [vmem:[#allocation5 + $0x1a8] sm:$0xff]  ;;  %v98_v16 = vld [vmem:[#allocation5 + $0x30] sm:$0xff] }
  0xf2   :  { %v5368_v3 = vcombine.low %v129_v24, %v145_v27 }
  0xf3   :  { %1829 = vmatmul.mubr.bf16.vlgmr.msra.gmra.mrb[0].mxu0 %v6707_v31  ;;  %1872 = vmatmul.mubr.bf16.vlgmr.msra.gmra.mrb[0].mxu1 %v6707_v31 }
  0xf4   :  { %1883 = vmatpush1.bf16.msra.mxu0 %v5330_v12  ;;  %1926 = vmatpush1.bf16.msra.mxu1 %v5332_v13  ;;  %v5524_v12 = vcombine.low %v287_v61, %v303_v0  ;;  %v96_v13 = vld [vmem:[#allocation5 + $0x20] sm:$0xff] }
  0xf5   :  { %1884 = vmatprep.subr.bf16.mxu0 %v5363_v32  ;;  %1927 = vmatprep.subr.bf16.mxu1 %v5365_v33  ;;  %v5335_v25 = vcombine.high %v96_v13, %v112_v14  ;;  %v5334_v28 = vcombine.low %v96_v13, %v112_v14  ;;  %v176_v32 = vld [vmem:[#allocation5 + $0x2a0] sm:$0xff]  ;;  %v161_v33 = vld [vmem:[#allocation5 + $0x228] sm:$0xff] }
  0xf6   :  { %1914 = vmatprep.mubr.bf16.mxu0 %v6600_v15  ;;  %1957 = vmatprep.mubr.bf16.mxu1 %v6600_v15  ;;  %v5399_v40 = vcombine.high %v160_v30, %v176_v32  ;;  %v5398_v43 = vcombine.low %v160_v30, %v176_v32  ;;  %v288_v61 = vld [vmem:[#allocation5 + $0x620] sm:$0xff] }
  0xf8   :  { %1885 = vmatpush1.bf16.msra.mxu0 %v5362_v35  ;;  %1928 = vmatpush1.bf16.msra.mxu1 %v5364_v36  ;;  %v5369_v35 = vcombine.high %v129_v24, %v145_v27  ;;  %v177_v36 = vld [vmem:[#allocation5 + $0x2a8] sm:$0xff]  ;;  %v130_v24 = vld [vmem:[#allocation5 + $0x130] sm:$0xff] }
  0xf9   :  { %1886 = vmatprep.subr.bf16.mxu0 %v5395_v4  ;;  %1929 = vmatprep.subr.bf16.mxu1 %v5397_v39  ;;  %v208_v4 = vld [vmem:[#allocation5 + $0x3a0] sm:$0xff]  ;;  %v193_v39 = vld [vmem:[#allocation5 + $0x328] sm:$0xff]  ;;  %v5400_v44 = vcombine.low %v161_v33, %v177_v36 }
  0xfa   :  { %v5431_v48 = vcombine.high %v192_v38, %v208_v4  ;;  %v5430_v51 = vcombine.low %v192_v38, %v208_v4 }
  0xfc   :  { %1887 = vmatpush1.bf16.msra.mxu0 %v5394_v41  ;;  %1930 = vmatpush1.bf16.msra.mxu1 %v5396_v42  ;;  %v5401_v41 = vcombine.high %v161_v33, %v177_v36  ;;  %v209_v42 = vld [vmem:[#allocation5 + $0x3a8] sm:$0xff]  ;;  %v162_v33 = vld [vmem:[#allocation5 + $0x230] sm:$0xff] }
  0xfd   :  { %1888 = vmatprep.subr.bf16.mxu0 %v5427_v46  ;;  %1931 = vmatprep.subr.bf16.mxu1 %v5429_v47  ;;  %v240_v46 = vld [vmem:[#allocation5 + $0x4a0] sm:$0xff]  ;;  %v225_v47 = vld [vmem:[#allocation5 + $0x428] sm:$0xff]  ;;  %v5432_v52 = vcombine.low %v193_v39, %v209_v42 }
  0xfe   :  { %v5463_v56 = vcombine.high %v224_v45, %v240_v46  ;;  %v5462_v59 = vcombine.low %v224_v45, %v240_v46 }
 0x100   :  { %1889 = vmatpush1.bf16.msra.mxu0 %v5426_v49  ;;  %1932 = vmatpush1.bf16.msra.mxu1 %v5428_v50  ;;  %v5433_v49 = vcombine.high %v193_v39, %v209_v42  ;;  %v241_v50 = vld [vmem:[#allocation5 + $0x4a8] sm:$0xff]  ;;  %v194_v39 = vld [vmem:[#allocation5 + $0x330] sm:$0xff] }
 0x101   :  { %1890 = vmatprep.subr.bf16.mxu0 %v5459_v54  ;;  %1933 = vmatprep.subr.bf16.mxu1 %v5461_v55  ;;  %v272_v54 = vld [vmem:[#allocation5 + $0x5a0] sm:$0xff]  ;;  %v257_v55 = vld [vmem:[#allocation5 + $0x528] sm:$0xff]  ;;  %v5464_v60 = vcombine.low %v225_v47, %v241_v50 }
 0x102   :  { %v5495_v0 = vcombine.high %v256_v53, %v272_v54  ;;  %v5494_v5 = vcombine.low %v256_v53, %v272_v54 }
 0x104   :  { %1891 = vmatpush1.bf16.msra.mxu0 %v5458_v57  ;;  %1934 = vmatpush1.bf16.msra.mxu1 %v5460_v58  ;;  %v5465_v57 = vcombine.high %v225_v47, %v241_v50  ;;  %v273_v58 = vld [vmem:[#allocation5 + $0x5a8] sm:$0xff]  ;;  %v226_v47 = vld [vmem:[#allocation5 + $0x430] sm:$0xff] }
 0x105   :  { %1892 = vmatprep.subr.bf16.mxu0 %v5491_v62  ;;  %1935 = vmatprep.subr.bf16.mxu1 %v5493_v63  ;;  %v304_v62 = vld [vmem:[#allocation5 + $0x6a0] sm:$0xff]  ;;  %v289_v63 = vld [vmem:[#allocation5 + $0x628] sm:$0xff]  ;;  %v5496_v6 = vcombine.low %v257_v55, %v273_v58 }
 0x106   :  { %v5527_v10 = vcombine.high %v288_v61, %v304_v62  ;;  %v5526_v13 = vcombine.low %v288_v61, %v304_v62 }
 0x108   :  { %1893 = vmatpush1.bf16.msra.mxu0 %v5490_v1  ;;  %1936 = vmatpush1.bf16.msra.mxu1 %v5492_v2  ;;  %v5497_v1 = vcombine.high %v257_v55, %v273_v58  ;;  %v305_v2 = vld [vmem:[#allocation5 + $0x6a8] sm:$0xff]  ;;  %v258_v55 = vld [vmem:[#allocation5 + $0x530] sm:$0xff] }
 0x109   :  { %1894 = vmatprep.subr.bf16.mxu0 %v5523_v8  ;;  %1937 = vmatprep.subr.bf16.mxu1 %v5525_v9  ;;  %v336_v8 = vld [vmem:[#allocation5 + $0x7a0] sm:$0xff]  ;;  %v321_v9 = vld [vmem:[#allocation5 + $0x728] sm:$0xff]  ;;  %v5528_v14 = vcombine.low %v289_v63, %v305_v2 }
 0x10a   :  { %v5559_v19 = vcombine.high %v320_v7, %v336_v8  ;;  %v5558_v22 = vcombine.low %v320_v7, %v336_v8 }
 0x10c   :  { %1895 = vmatpush1.bf16.msra.mxu0 %v5522_v11  ;;  %1938 = vmatpush1.bf16.msra.mxu1 %v5524_v12  ;;  %v5529_v11 = vcombine.high %v289_v63, %v305_v2  ;;  %v337_v12 = vld [vmem:[#allocation5 + $0x7a8] sm:$0xff]  ;;  %v290_v63 = vld [vmem:[#allocation5 + $0x630] sm:$0xff] }
 0x10d   :  { %1896 = vmatprep.subr.bf16.mxu0 %v5555_v17  ;;  %1939 = vmatprep.subr.bf16.mxu1 %v5557_v18  ;;  %v114_v17 = vld [vmem:[#allocation5 + $0xb0] sm:$0xff]  ;;  %v99_v18 = vld [vmem:[#allocation5 + $0x38] sm:$0xff]  ;;  %v5560_v23 = vcombine.low %v321_v9, %v337_v12 }
 0x10e   :  { %v5339_v27 = vcombine.high %v98_v16, %v114_v17  ;;  %v5338_v30 = vcombine.low %v98_v16, %v114_v17 }
 0x110   :  { %1897 = vmatpush1.bf16.msra.mxu0 %v5554_v20  ;;  %1940 = vmatpush1.bf16.msra.mxu1 %v5556_v21  ;;  %v5561_v20 = vcombine.high %v321_v9, %v337_v12  ;;  %v115_v21 = vld [vmem:[#allocation5 + $0xb8] sm:$0xff]  ;;  %v322_v9 = vld [vmem:[#allocation5 + $0x730] sm:$0xff] }
 0x111   :  { %1968 = vmatprep.subr.bf16.mxu0 %v5335_v25  ;;  %2011 = vmatprep.subr.bf16.mxu1 %v5337_v26  ;;  %v146_v25 = vld [vmem:[#allocation5 + $0x1b0] sm:$0xff]  ;;  %v131_v26 = vld [vmem:[#allocation5 + $0x138] sm:$0xff]  ;;  %v5340_v32 = vcombine.low %v99_v18, %v115_v21 }
 0x112   :  { %v5371_v36 = vcombine.high %v130_v24, %v146_v25  ;;  %v5370_v38 = vcombine.low %v130_v24, %v146_v25 }
 0x113   :  { %1915 = vmatmul.mubr.bf16.vlgmr.msra.gmra.mrb[4].mxu0 %v6707_v31  ;;  %1958 = vmatmul.mubr.bf16.vlgmr.msra.gmra.mrb[4].mxu1 %v6707_v31 }
 0x114   :  { %1969 = vmatpush1.bf16.msra.mxu0 %v5334_v28  ;;  %2012 = vmatpush1.bf16.msra.mxu1 %v5336_v29  ;;  %v5341_v28 = vcombine.high %v99_v18, %v115_v21  ;;  %v147_v29 = vld [vmem:[#allocation5 + $0x1b8] sm:$0xff]  ;;  %v100_v18 = vld [vmem:[#allocation5 + $0x40] sm:$0xff] }
 0x115   :  { %1970 = vmatprep.subr.bf16.mxu0 %v5367_v34  ;;  %2013 = vmatprep.subr.bf16.mxu1 %v5369_v35  ;;  %v178_v34 = vld [vmem:[#allocation5 + $0x2b0] sm:$0xff]  ;;  %v163_v35 = vld [vmem:[#allocation5 + $0x238] sm:$0xff]  ;;  %v5372_v4 = vcombine.low %v131_v26, %v147_v29 }
 0x116   :  { %2000 = vmatprep.mubr.bf16.mxu0 %v6600_v15  ;;  %2043 = vmatprep.mubr.bf16.mxu1 %v6600_v15  ;;  %v5403_v42 = vcombine.high %v162_v33, %v178_v34  ;;  %v5402_v45 = vcombine.low %v162_v33, %v178_v34 }
 0x118   :  { %1971 = vmatpush1.bf16.msra.mxu0 %v5366_v37  ;;  %2014 = vmatpush1.bf16.msra.mxu1 %v5368_v3  ;;  %v5373_v37 = vcombine.high %v131_v26, %v147_v29  ;;  %v179_v3 = vld [vmem:[#allocation5 + $0x2b8] sm:$0xff]  ;;  %v148_v29 = vld [vmem:[#allocation5 + $0x1c0] sm:$0xff] }
 0x119   :  { %1972 = vmatprep.subr.bf16.mxu0 %v5399_v40  ;;  %2015 = vmatprep.subr.bf16.mxu1 %v5401_v41  ;;  %v210_v40 = vld [vmem:[#allocation5 + $0x3b0] sm:$0xff]  ;;  %v195_v41 = vld [vmem:[#allocation5 + $0x338] sm:$0xff]  ;;  %v5404_v46 = vcombine.low %v163_v35, %v179_v3 }
 0x11a   :  { %v5435_v50 = vcombine.high %v194_v39, %v210_v40  ;;  %v5434_v53 = vcombine.low %v194_v39, %v210_v40 }
 0x11c   :  { %1973 = vmatpush1.bf16.msra.mxu0 %v5398_v43  ;;  %2016 = vmatpush1.bf16.msra.mxu1 %v5400_v44  ;;  %v5405_v43 = vcombine.high %v163_v35, %v179_v3  ;;  %v211_v44 = vld [vmem:[#allocation5 + $0x3b8] sm:$0xff]  ;;  %v180_v3 = vld [vmem:[#allocation5 + $0x2c0] sm:$0xff] }
 0x11d   :  { %1974 = vmatprep.subr.bf16.mxu0 %v5431_v48  ;;  %2017 = vmatprep.subr.bf16.mxu1 %v5433_v49  ;;  %v242_v48 = vld [vmem:[#allocation5 + $0x4b0] sm:$0xff]  ;;  %v227_v49 = vld [vmem:[#allocation5 + $0x438] sm:$0xff]  ;;  %v5436_v54 = vcombine.low %v195_v41, %v211_v44 }
 0x11e   :  { %v5467_v58 = vcombine.high %v226_v47, %v242_v48  ;;  %v5466_v61 = vcombine.low %v226_v47, %v242_v48 }
 0x120   :  { %1975 = vmatpush1.bf16.msra.mxu0 %v5430_v51  ;;  %2018 = vmatpush1.bf16.msra.mxu1 %v5432_v52  ;;  %v5437_v51 = vcombine.high %v195_v41, %v211_v44  ;;  %v243_v52 = vld [vmem:[#allocation5 + $0x4b8] sm:$0xff]  ;;  %v212_v44 = vld [vmem:[#allocation5 + $0x3c0] sm:$0xff] }
 0x121   :  { %1976 = vmatprep.subr.bf16.mxu0 %v5463_v56  ;;  %2019 = vmatprep.subr.bf16.mxu1 %v5465_v57  ;;  %v274_v56 = vld [vmem:[#allocation5 + $0x5b0] sm:$0xff]  ;;  %v259_v57 = vld [vmem:[#allocation5 + $0x538] sm:$0xff]  ;;  %v5468_v62 = vcombine.low %v227_v49, %v243_v52 }
 0x122   :  { %v5498_v7 = vcombine.low %v258_v55, %v274_v56 }
 0x124   :  { %1977 = vmatpush1.bf16.msra.mxu0 %v5462_v59  ;;  %2020 = vmatpush1.bf16.msra.mxu1 %v5464_v60  ;;  %v5469_v59 = vcombine.high %v227_v49, %v243_v52  ;;  %v275_v60 = vld [vmem:[#allocation5 + $0x5b8] sm:$0xff]  ;;  %v244_v52 = vld [vmem:[#allocation5 + $0x4c0] sm:$0xff] }
 0x125   :  { %1978 = vmatprep.subr.bf16.mxu0 %v5495_v0  ;;  %2021 = vmatprep.subr.bf16.mxu1 %v5497_v1  ;;  %v306_v0 = vld [vmem:[#allocation5 + $0x6b0] sm:$0xff]  ;;  %v5499_v1 = vcombine.high %v258_v55, %v274_v56  ;;  %v5501_v2 = vcombine.high %v259_v57, %v275_v60  ;;  %v5500_v8 = vcombine.low %v259_v57, %v275_v60  ;;  %v276_v60 = vld [vmem:[#allocation5 + $0x5c0] sm:$0xff] }
 0x126   :  { %v5530_v16 = vcombine.low %v290_v63, %v306_v0 }
 0x128   :  { %1979 = vmatpush1.bf16.msra.mxu0 %v5494_v5  ;;  %2022 = vmatpush1.bf16.msra.mxu1 %v5496_v6  ;;  %v291_v5 = vld [vmem:[#allocation5 + $0x638] sm:$0xff] }
 0x129   :  { %1980 = vmatprep.subr.bf16.mxu0 %v5527_v10  ;;  %2023 = vmatprep.subr.bf16.mxu1 %v5529_v11  ;;  %v307_v6 = vld [vmem:[#allocation5 + $0x6b8] sm:$0xff]  ;;  %v338_v10 = vld [vmem:[#allocation5 + $0x7b0] sm:$0xff]  ;;  %v5531_v11 = vcombine.high %v290_v63, %v306_v0 }
 0x12a   :  { %v5533_v12 = vcombine.high %v291_v5, %v307_v6  ;;  %v5532_v17 = vcombine.low %v291_v5, %v307_v6  ;;  %v5563_v21 = vcombine.high %v322_v9, %v338_v10  ;;  %v5562_v24 = vcombine.low %v322_v9, %v338_v10  ;;  %v292_v5 = vld [vmem:[#allocation5 + $0x640] sm:$0xff] }
 0x12b   :  { %v308_v6 = vld [vmem:[#allocation5 + $0x6c0] sm:$0xff] }
 0x12c   :  { %1981 = vmatpush1.bf16.msra.mxu0 %v5526_v13  ;;  %2024 = vmatpush1.bf16.msra.mxu1 %v5528_v14  ;;  %v323_v13 = vld [vmem:[#allocation5 + $0x738] sm:$0xff] }
 0x12d   :  { %1982 = vmatprep.subr.bf16.mxu0 %v5559_v19  ;;  %2025 = vmatprep.subr.bf16.mxu1 %v5561_v20  ;;  %v339_v14 = vld [vmem:[#allocation5 + $0x7b8] sm:$0xff]  ;;  %v116_v19 = vld [vmem:[#allocation5 + $0xc0] sm:$0xff]  ;;  %v101_v20 = vld [vmem:[#allocation5 + $0x48] sm:$0xff] }
 0x12e   :  { %v5564_v25 = vcombine.low %v323_v13, %v339_v14  ;;  %v5343_v26 = vcombine.high %v100_v18, %v116_v19  ;;  %v5342_v33 = vcombine.low %v100_v18, %v116_v19  ;;  %v5534_v18 = vcombine.low %v292_v5, %v308_v6 }
 0x130   :  { %1983 = vmatpush1.bf16.msra.mxu0 %v5558_v22  ;;  %2026 = vmatpush1.bf16.msra.mxu1 %v5560_v23  ;;  %v5565_v22 = vcombine.high %v323_v13, %v339_v14  ;;  %v117_v23 = vld [vmem:[#allocation5 + $0xc8] sm:$0xff]  ;;  %v324_v13 = vld [vmem:[#allocation5 + $0x740] sm:$0xff] }
 0x131   :  { %2054 = vmatprep.subr.bf16.mxu0 %v5339_v27  ;;  %2097 = vmatprep.subr.bf16.mxu1 %v5341_v28  ;;  %v5345_v27 = vcombine.high %v101_v20, %v117_v23  ;;  %v132_v28 = vld [vmem:[#allocation5 + $0x140] sm:$0xff]  ;;  %v5344_v34 = vcombine.low %v101_v20, %v117_v23  ;;  %v118_v23 = vld [vmem:[#allocation5 + $0xd0] sm:$0xff] }
 0x132   :  { %v5375_v35 = vcombine.high %v132_v28, %v148_v29  ;;  %v5374_v39 = vcombine.low %v132_v28, %v148_v29  ;;  %v340_v14 = vld [vmem:[#allocation5 + $0x7c0] sm:$0xff] }
 0x133   :  { %2001 = vmatmul.mubr.bf16.vlgmr.msra.gmra.mrb[8].mxu0 %v6707_v31  ;;  %2044 = vmatmul.mubr.bf16.vlgmr.msra.gmra.mrb[8].mxu1 %v6707_v31  ;;  %v5567_v20 = vcombine.high %v324_v13, %v340_v14 }
 0x134   :  { %2055 = vmatpush1.bf16.msra.mxu0 %v5338_v30  ;;  %2098 = vmatpush1.bf16.msra.mxu1 %v5340_v32  ;;  %v133_v30 = vld [vmem:[#allocation5 + $0x148] sm:$0xff] }
 0x135   :  { %2056 = vmatprep.subr.bf16.mxu0 %v5371_v36  ;;  %2099 = vmatprep.subr.bf16.mxu1 %v5373_v37  ;;  %v149_v32 = vld [vmem:[#allocation5 + $0x1c8] sm:$0xff]  ;;  %v164_v37 = vld [vmem:[#allocation5 + $0x240] sm:$0xff] }
 0x136   :  { %2086 = vmatprep.mubr.bf16.mxu0 %v6600_v15  ;;  %2129 = vmatprep.mubr.bf16.mxu1 %v6600_v15  ;;  %v5377_v36 = vcombine.high %v133_v30, %v149_v32  ;;  %v5376_v40 = vcombine.low %v133_v30, %v149_v32  ;;  %v5407_v41 = vcombine.high %v164_v37, %v180_v3  ;;  %v134_v30 = vld [vmem:[#allocation5 + $0x150] sm:$0xff] }
 0x137   :  { %v5406_v47 = vcombine.low %v164_v37, %v180_v3  ;;  %v150_v32 = vld [vmem:[#allocation5 + $0x1d0] sm:$0xff] }
 0x138   :  { %2057 = vmatpush1.bf16.msra.mxu0 %v5370_v38  ;;  %2100 = vmatpush1.bf16.msra.mxu1 %v5372_v4  ;;  %v165_v38 = vld [vmem:[#allocation5 + $0x248] sm:$0xff]  ;;  %v5379_v37 = vcombine.high %v134_v30, %v150_v32 }
 0x139   :  { %2058 = vmatprep.subr.bf16.mxu0 %v5403_v42  ;;  %2101 = vmatprep.subr.bf16.mxu1 %v5405_v43  ;;  %v181_v4 = vld [vmem:[#allocation5 + $0x2c8] sm:$0xff]  ;;  %v196_v43 = vld [vmem:[#allocation5 + $0x340] sm:$0xff] }
 0x13a   :  { %v5409_v42 = vcombine.high %v165_v38, %v181_v4  ;;  %v5408_v48 = vcombine.low %v165_v38, %v181_v4  ;;  %v5439_v49 = vcombine.high %v196_v43, %v212_v44  ;;  %v5438_v55 = vcombine.low %v196_v43, %v212_v44  ;;  %v166_v38 = vld [vmem:[#allocation5 + $0x250] sm:$0xff] }
 0x13b   :  { %v182_v4 = vld [vmem:[#allocation5 + $0x2d0] sm:$0xff] }
 0x13c   :  { %2059 = vmatpush1.bf16.msra.mxu0 %v5402_v45  ;;  %2102 = vmatpush1.bf16.msra.mxu1 %v5404_v46  ;;  %v197_v45 = vld [vmem:[#allocation5 + $0x348] sm:$0xff]  ;;  %v5411_v43 = vcombine.high %v166_v38, %v182_v4 }
 0x13d   :  { %2060 = vmatprep.subr.bf16.mxu0 %v5435_v50  ;;  %2103 = vmatprep.subr.bf16.mxu1 %v5437_v51  ;;  %v213_v46 = vld [vmem:[#allocation5 + $0x3c8] sm:$0xff]  ;;  %v228_v51 = vld [vmem:[#allocation5 + $0x440] sm:$0xff] }
 0x13e   :  { %v5441_v50 = vcombine.high %v197_v45, %v213_v46  ;;  %v5440_v56 = vcombine.low %v197_v45, %v213_v46  ;;  %v5471_v57 = vcombine.high %v228_v51, %v244_v52  ;;  %v5470_v63 = vcombine.low %v228_v51, %v244_v52  ;;  %v198_v45 = vld [vmem:[#allocation5 + $0x350] sm:$0xff] }
 0x13f   :  { %v214_v46 = vld [vmem:[#allocation5 + $0x3d0] sm:$0xff] }
 0x140   :  { %2061 = vmatpush1.bf16.msra.mxu0 %v5434_v53  ;;  %2104 = vmatpush1.bf16.msra.mxu1 %v5436_v54  ;;  %v229_v53 = vld [vmem:[#allocation5 + $0x448] sm:$0xff]  ;;  %v5443_v51 = vcombine.high %v198_v45, %v214_v46 }
 0x141   :  { %2062 = vmatprep.subr.bf16.mxu0 %v5467_v58  ;;  %2105 = vmatprep.subr.bf16.mxu1 %v5469_v59  ;;  %v245_v54 = vld [vmem:[#allocation5 + $0x4c8] sm:$0xff]  ;;  %v260_v59 = vld [vmem:[#allocation5 + $0x540] sm:$0xff] }
 0x142   :  { %v5473_v58 = vcombine.high %v229_v53, %v245_v54  ;;  %v5472_v0 = vcombine.low %v229_v53, %v245_v54  ;;  %v5502_v9 = vcombine.low %v260_v59, %v276_v60  ;;  %v230_v53 = vld [vmem:[#allocation5 + $0x450] sm:$0xff] }
 0x143   :  { %v246_v54 = vld [vmem:[#allocation5 + $0x4d0] sm:$0xff] }
 0x144   :  { %2063 = vmatpush1.bf16.msra.mxu0 %v5466_v61  ;;  %2106 = vmatpush1.bf16.msra.mxu1 %v5468_v62  ;;  %v261_v61 = vld [vmem:[#allocation5 + $0x548] sm:$0xff] }
 0x145   :  { %2064 = vmatprep.subr.bf16.mxu0 %v5499_v1  ;;  %2107 = vmatprep.subr.bf16.mxu1 %v5501_v2  ;;  %v277_v62 = vld [vmem:[#allocation5 + $0x5c8] sm:$0xff]  ;;  %v5503_v1 = vcombine.high %v260_v59, %v276_v60  ;;  %v5475_v59 = vcombine.high %v230_v53, %v246_v54 }
 0x146   :  { %v5505_v2 = vcombine.high %v261_v61, %v277_v62  ;;  %v5504_v10 = vcombine.low %v261_v61, %v277_v62  ;;  %v262_v61 = vld [vmem:[#allocation5 + $0x550] sm:$0xff] }
 0x147   :  { %v278_v62 = vld [vmem:[#allocation5 + $0x5d0] sm:$0xff] }
 0x148   :  { %2065 = vmatpush1.bf16.msra.mxu0 %v5498_v7  ;;  %2108 = vmatpush1.bf16.msra.mxu1 %v5500_v8  ;;  %v293_v7 = vld [vmem:[#allocation5 + $0x648] sm:$0xff] }
 0x149   :  { %2066 = vmatprep.subr.bf16.mxu0 %v5531_v11  ;;  %2109 = vmatprep.subr.bf16.mxu1 %v5533_v12  ;;  %v309_v8 = vld [vmem:[#allocation5 + $0x6c8] sm:$0xff]  ;;  %v5535_v11 = vcombine.high %v292_v5, %v308_v6  ;;  %v5507_v5 = vcombine.high %v262_v61, %v278_v62 }
 0x14a   :  { %v5537_v12 = vcombine.high %v293_v7, %v309_v8  ;;  %v5536_v19 = vcombine.low %v293_v7, %v309_v8  ;;  %v294_v7 = vld [vmem:[#allocation5 + $0x650] sm:$0xff] }
 0x14b   :  { %v310_v8 = vld [vmem:[#allocation5 + $0x6d0] sm:$0xff] }
 0x14c   :  { %2067 = vmatpush1.bf16.msra.mxu0 %v5530_v16  ;;  %2110 = vmatpush1.bf16.msra.mxu1 %v5532_v17  ;;  %v325_v16 = vld [vmem:[#allocation5 + $0x748] sm:$0xff] }
 0x14d   :  { %2068 = vmatprep.subr.bf16.mxu0 %v5563_v21  ;;  %2111 = vmatprep.subr.bf16.mxu1 %v5565_v22  ;;  %v341_v17 = vld [vmem:[#allocation5 + $0x7c8] sm:$0xff]  ;;  %v102_v22 = vld [vmem:[#allocation5 + $0x50] sm:$0xff] }
 0x14e   :  { %v5569_v21 = vcombine.high %v325_v16, %v341_v17  ;;  %v5347_v28 = vcombine.high %v102_v22, %v118_v23 }
 0x150   :  { %2069 = vmatpush1.bf16.msra.mxu0 %v5562_v24  ;;  %2112 = vmatpush1.bf16.msra.mxu1 %v5564_v25  ;;  %v103_v24 = vld [vmem:[#allocation5 + $0x58] sm:$0xff] }
 0x151   :  { %2140 = vmatprep.subr.bf16.mxu0 %v5343_v26  ;;  %2183 = vmatprep.subr.bf16.mxu1 %v5345_v27  ;;  %v119_v25 = vld [vmem:[#allocation5 + $0xd8] sm:$0xff]  ;;  %v5566_v26 = vcombine.low %v324_v13, %v340_v14  ;;  %v5568_v27 = vcombine.low %v325_v16, %v341_v17  ;;  %v5539_v13 = vcombine.high %v294_v7, %v310_v8  ;;  %v326_v16 = vld [vmem:[#allocation5 + $0x750] sm:$0xff] }
 0x152   :  { %v5349_v29 = vcombine.high %v103_v24, %v119_v25  ;;  %v342_v17 = vld [vmem:[#allocation5 + $0x7d0] sm:$0xff] }
 0x153   :  { %2087 = vmatmul.mubr.bf16.vlgmr.msra.gmra.mrb[12].mxu0 %v6707_v31  ;;  %2130 = vmatmul.mubr.bf16.vlgmr.msra.gmra.mrb[12].mxu1 %v6707_v31 }
 0x154   :  { %2141 = vmatpush1.bf16.msra.mxu0 %v5342_v33  ;;  %2184 = vmatpush1.bf16.msra.mxu1 %v5344_v34  ;;  %v135_v33 = vld [vmem:[#allocation5 + $0x158] sm:$0xff] }
 0x155   :  { %2142 = vmatprep.subr.bf16.mxu0 %v5375_v35  ;;  %2185 = vmatprep.subr.bf16.mxu1 %v5377_v36  ;;  %v151_v34 = vld [vmem:[#allocation5 + $0x1d8] sm:$0xff]  ;;  %v5346_v35 = vcombine.low %v102_v22, %v118_v23  ;;  %v5348_v36 = vcombine.low %v103_v24, %v119_v25  ;;  %v5571_v22 = vcombine.high %v326_v16, %v342_v17  ;;  %v104_v24 = vld [vmem:[#allocation5 + $0x60] sm:$0xff] }
 0x156   :  { %2172 = vmatprep.mubr.bf16.mxu0 %v6600_v15  ;;  %2215 = vmatprep.mubr.bf16.mxu1 %v6600_v15  ;;  %v5381_v3 = vcombine.high %v135_v33, %v151_v34  ;;  %v120_v25 = vld [vmem:[#allocation5 + $0xe0] sm:$0xff] }
 0x158   :  { %2143 = vmatpush1.bf16.msra.mxu0 %v5374_v39  ;;  %2186 = vmatpush1.bf16.msra.mxu1 %v5376_v40  ;;  %v167_v39 = vld [vmem:[#allocation5 + $0x258] sm:$0xff] }
 0x159   :  { %2144 = vmatprep.subr.bf16.mxu0 %v5407_v41  ;;  %2187 = vmatprep.subr.bf16.mxu1 %v5409_v42  ;;  %v183_v40 = vld [vmem:[#allocation5 + $0x2d8] sm:$0xff]  ;;  %v5378_v41 = vcombine.low %v134_v30, %v150_v32  ;;  %v5380_v42 = vcombine.low %v135_v33, %v151_v34  ;;  %v5351_v30 = vcombine.high %v104_v24, %v120_v25  ;;  %v136_v33 = vld [vmem:[#allocation5 + $0x160] sm:$0xff] }
 0x15a   :  { %v5413_v44 = vcombine.high %v167_v39, %v183_v40  ;;  %v152_v34 = vld [vmem:[#allocation5 + $0x1e0] sm:$0xff] }
 0x15c   :  { %2145 = vmatpush1.bf16.msra.mxu0 %v5406_v47  ;;  %2188 = vmatpush1.bf16.msra.mxu1 %v5408_v48  ;;  %v199_v47 = vld [vmem:[#allocation5 + $0x358] sm:$0xff] }
 0x15d   :  { %2146 = vmatprep.subr.bf16.mxu0 %v5439_v49  ;;  %2189 = vmatprep.subr.bf16.mxu1 %v5441_v50  ;;  %v215_v48 = vld [vmem:[#allocation5 + $0x3d8] sm:$0xff]  ;;  %v5410_v49 = vcombine.low %v166_v38, %v182_v4  ;;  %v5412_v50 = vcombine.low %v167_v39, %v183_v40  ;;  %v5383_v38 = vcombine.high %v136_v33, %v152_v34  ;;  %v168_v39 = vld [vmem:[#allocation5 + $0x260] sm:$0xff] }
 0x15e   :  { %v5445_v52 = vcombine.high %v199_v47, %v215_v48  ;;  %v184_v40 = vld [vmem:[#allocation5 + $0x2e0] sm:$0xff] }
 0x160   :  { %2147 = vmatpush1.bf16.msra.mxu0 %v5438_v55  ;;  %2190 = vmatpush1.bf16.msra.mxu1 %v5440_v56  ;;  %v231_v55 = vld [vmem:[#allocation5 + $0x458] sm:$0xff] }
 0x161   :  { %2148 = vmatprep.subr.bf16.mxu0 %v5471_v57  ;;  %2191 = vmatprep.subr.bf16.mxu1 %v5473_v58  ;;  %v247_v56 = vld [vmem:[#allocation5 + $0x4d8] sm:$0xff]  ;;  %v5442_v57 = vcombine.low %v198_v45, %v214_v46  ;;  %v5444_v58 = vcombine.low %v199_v47, %v215_v48  ;;  %v5415_v45 = vcombine.high %v168_v39, %v184_v40  ;;  %v200_v47 = vld [vmem:[#allocation5 + $0x360] sm:$0xff] }
 0x162   :  { %v5477_v60 = vcombine.high %v231_v55, %v247_v56  ;;  %v216_v48 = vld [vmem:[#allocation5 + $0x3e0] sm:$0xff] }
 0x164   :  { %2149 = vmatpush1.bf16.msra.mxu0 %v5470_v63  ;;  %2192 = vmatpush1.bf16.msra.mxu1 %v5472_v0  ;;  %v263_v63 = vld [vmem:[#allocation5 + $0x558] sm:$0xff] }
 0x165   :  { %2150 = vmatprep.subr.bf16.mxu0 %v5503_v1  ;;  %2193 = vmatprep.subr.bf16.mxu1 %v5505_v2  ;;  %v279_v0 = vld [vmem:[#allocation5 + $0x5d8] sm:$0xff]  ;;  %v5474_v1 = vcombine.low %v230_v53, %v246_v54  ;;  %v5476_v2 = vcombine.low %v231_v55, %v247_v56  ;;  %v5447_v53 = vcombine.high %v200_v47, %v216_v48  ;;  %v232_v55 = vld [vmem:[#allocation5 + $0x460] sm:$0xff] }
 0x166   :  { %v5509_v6 = vcombine.high %v263_v63, %v279_v0  ;;  %v248_v56 = vld [vmem:[#allocation5 + $0x4e0] sm:$0xff] }
 0x168   :  { %2151 = vmatpush1.bf16.msra.mxu0 %v5502_v9  ;;  %2194 = vmatpush1.bf16.msra.mxu1 %v5504_v10  ;;  %v295_v9 = vld [vmem:[#allocation5 + $0x658] sm:$0xff] }
 0x169   :  { %2152 = vmatprep.subr.bf16.mxu0 %v5535_v11  ;;  %2195 = vmatprep.subr.bf16.mxu1 %v5537_v12  ;;  %v311_v10 = vld [vmem:[#allocation5 + $0x6d8] sm:$0xff]  ;;  %v5506_v11 = vcombine.low %v262_v61, %v278_v62  ;;  %v5508_v12 = vcombine.low %v263_v63, %v279_v0  ;;  %v5479_v61 = vcombine.high %v232_v55, %v248_v56  ;;  %v264_v63 = vld [vmem:[#allocation5 + $0x560] sm:$0xff] }
 0x16a   :  { %v5541_v14 = vcombine.high %v295_v9, %v311_v10  ;;  %v280_v0 = vld [vmem:[#allocation5 + $0x5e0] sm:$0xff] }
 0x16c   :  { %2153 = vmatpush1.bf16.msra.mxu0 %v5534_v18  ;;  %2196 = vmatpush1.bf16.msra.mxu1 %v5536_v19  ;;  %v327_v18 = vld [vmem:[#allocation5 + $0x758] sm:$0xff] }
 0x16d   :  { %2154 = vmatprep.subr.bf16.mxu0 %v5567_v20  ;;  %2197 = vmatprep.subr.bf16.mxu1 %v5569_v21  ;;  %v343_v19 = vld [vmem:[#allocation5 + $0x7d8] sm:$0xff]  ;;  %v5538_v20 = vcombine.low %v294_v7, %v310_v8  ;;  %v5540_v21 = vcombine.low %v295_v9, %v311_v10  ;;  %v5511_v7 = vcombine.high %v264_v63, %v280_v0  ;;  %v296_v9 = vld [vmem:[#allocation5 + $0x660] sm:$0xff] }
 0x16e   :  { %v5573_v23 = vcombine.high %v327_v18, %v343_v19  ;;  %v312_v10 = vld [vmem:[#allocation5 + $0x6e0] sm:$0xff] }
 0x170   :  { %2155 = vmatpush1.bf16.msra.mxu0 %v5566_v26  ;;  %2198 = vmatpush1.bf16.msra.mxu1 %v5568_v27  ;;  %v105_v26 = vld [vmem:[#allocation5 + $0x68] sm:$0xff] }
 0x171   :  { %2226 = vmatprep.subr.bf16.mxu0 %v5347_v28  ;;  %2269 = vmatprep.subr.bf16.mxu1 %v5349_v29  ;;  %v121_v27 = vld [vmem:[#allocation5 + $0xe8] sm:$0xff]  ;;  %v5570_v28 = vcombine.low %v326_v16, %v342_v17  ;;  %v5572_v29 = vcombine.low %v327_v18, %v343_v19  ;;  %v5543_v16 = vcombine.high %v296_v9, %v312_v10  ;;  %v328_v18 = vld [vmem:[#allocation5 + $0x760] sm:$0xff] }
 0x172   :  { %v5353_v32 = vcombine.high %v105_v26, %v121_v27  ;;  %v344_v19 = vld [vmem:[#allocation5 + $0x7e0] sm:$0xff] }
 0x173   :  { %2173 = vmatmul.mubr.bf16.vlgmr.msra.gmra.mrb[16].mxu0 %v6707_v31  ;;  %2216 = vmatmul.mubr.bf16.vlgmr.msra.gmra.mrb[16].mxu1 %v6707_v31 }
 0x174   :  { %2227 = vmatpush1.bf16.msra.mxu0 %v5346_v35  ;;  %2270 = vmatpush1.bf16.msra.mxu1 %v5348_v36  ;;  %v137_v35 = vld [vmem:[#allocation5 + $0x168] sm:$0xff] }
 0x175   :  { %2228 = vmatprep.subr.bf16.mxu0 %v5379_v37  ;;  %2271 = vmatprep.subr.bf16.mxu1 %v5381_v3  ;;  %v153_v36 = vld [vmem:[#allocation5 + $0x1e8] sm:$0xff]  ;;  %v5350_v37 = vcombine.low %v104_v24, %v120_v25  ;;  %v5352_v3 = vcombine.low %v105_v26, %v121_v27  ;;  %v5575_v24 = vcombine.high %v328_v18, %v344_v19  ;;  %v106_v26 = vld [vmem:[#allocation5 + $0x70] sm:$0xff] }
 0x176   :  { %2258 = vmatprep.mubr.bf16.mxu0 %v6600_v15  ;;  %2301 = vmatprep.mubr.bf16.mxu1 %v6600_v15  ;;  %v5385_v4 = vcombine.high %v137_v35, %v153_v36  ;;  %v122_v27 = vld [vmem:[#allocation5 + $0xf0] sm:$0xff] }
 0x178   :  { %2229 = vmatpush1.bf16.msra.mxu0 %v5378_v41  ;;  %2272 = vmatpush1.bf16.msra.mxu1 %v5380_v42  ;;  %v169_v41 = vld [vmem:[#allocation5 + $0x268] sm:$0xff] }
 0x179   :  { %2230 = vmatprep.subr.bf16.mxu0 %v5411_v43  ;;  %2273 = vmatprep.subr.bf16.mxu1 %v5413_v44  ;;  %v185_v42 = vld [vmem:[#allocation5 + $0x2e8] sm:$0xff]  ;;  %v5382_v43 = vcombine.low %v136_v33, %v152_v34  ;;  %v5384_v44 = vcombine.low %v137_v35, %v153_v36  ;;  %v5355_v33 = vcombine.high %v106_v26, %v122_v27  ;;  %v138_v35 = vld [vmem:[#allocation5 + $0x170] sm:$0xff] }
 0x17a   :  { %v5417_v46 = vcombine.high %v169_v41, %v185_v42  ;;  %v154_v36 = vld [vmem:[#allocation5 + $0x1f0] sm:$0xff] }
 0x17c   :  { %2231 = vmatpush1.bf16.msra.mxu0 %v5410_v49  ;;  %2274 = vmatpush1.bf16.msra.mxu1 %v5412_v50  ;;  %v201_v49 = vld [vmem:[#allocation5 + $0x368] sm:$0xff] }
 0x17d   :  { %2232 = vmatprep.subr.bf16.mxu0 %v5443_v51  ;;  %2275 = vmatprep.subr.bf16.mxu1 %v5445_v52  ;;  %v217_v50 = vld [vmem:[#allocation5 + $0x3e8] sm:$0xff]  ;;  %v5414_v51 = vcombine.low %v168_v39, %v184_v40  ;;  %v5416_v52 = vcombine.low %v169_v41, %v185_v42  ;;  %v5387_v39 = vcombine.high %v138_v35, %v154_v36  ;;  %v170_v41 = vld [vmem:[#allocation5 + $0x270] sm:$0xff] }
 0x17e   :  { %v5449_v54 = vcombine.high %v201_v49, %v217_v50  ;;  %v186_v42 = vld [vmem:[#allocation5 + $0x2f0] sm:$0xff] }
 0x180   :  { %2233 = vmatpush1.bf16.msra.mxu0 %v5442_v57  ;;  %2276 = vmatpush1.bf16.msra.mxu1 %v5444_v58  ;;  %v233_v57 = vld [vmem:[#allocation5 + $0x468] sm:$0xff] }
 0x181   :  { %2234 = vmatprep.subr.bf16.mxu0 %v5475_v59  ;;  %2277 = vmatprep.subr.bf16.mxu1 %v5477_v60  ;;  %v249_v58 = vld [vmem:[#allocation5 + $0x4e8] sm:$0xff]  ;;  %v5446_v59 = vcombine.low %v200_v47, %v216_v48  ;;  %v5448_v60 = vcombine.low %v201_v49, %v217_v50  ;;  %v5419_v47 = vcombine.high %v170_v41, %v186_v42  ;;  %v202_v49 = vld [vmem:[#allocation5 + $0x370] sm:$0xff] }
 0x182   :  { %v5481_v62 = vcombine.high %v233_v57, %v249_v58  ;;  %v218_v50 = vld [vmem:[#allocation5 + $0x3f0] sm:$0xff] }
 0x184   :  { %2235 = vmatpush1.bf16.msra.mxu0 %v5474_v1  ;;  %2278 = vmatpush1.bf16.msra.mxu1 %v5476_v2  ;;  %v265_v1 = vld [vmem:[#allocation5 + $0x568] sm:$0xff] }
 0x185   :  { %2236 = vmatprep.subr.bf16.mxu0 %v5507_v5  ;;  %2279 = vmatprep.subr.bf16.mxu1 %v5509_v6  ;;  %v281_v2 = vld [vmem:[#allocation5 + $0x5e8] sm:$0xff]  ;;  %v5478_v5 = vcombine.low %v232_v55, %v248_v56  ;;  %v5480_v6 = vcombine.low %v233_v57, %v249_v58  ;;  %v5451_v56 = vcombine.high %v202_v49, %v218_v50  ;;  %v234_v58 = vld [vmem:[#allocation5 + $0x470] sm:$0xff] }
 0x186   :  { %v5513_v8 = vcombine.high %v265_v1, %v281_v2 }
 0x188   :  { %2237 = vmatpush1.bf16.msra.mxu0 %v5506_v11  ;;  %2280 = vmatpush1.bf16.msra.mxu1 %v5508_v12  ;;  %v297_v11 = vld [vmem:[#allocation5 + $0x668] sm:$0xff] }
 0x189   :  { %2238 = vmatprep.subr.bf16.mxu0 %v5539_v13  ;;  %2281 = vmatprep.subr.bf16.mxu1 %v5541_v14  ;;  %v313_v12 = vld [vmem:[#allocation5 + $0x6e8] sm:$0xff]  ;;  %v5510_v13 = vcombine.low %v264_v63, %v280_v0  ;;  %v5512_v14 = vcombine.low %v265_v1, %v281_v2  ;;  %v5450_v63 = vcombine.low %v202_v49, %v218_v50  ;;  %v266_v2 = vld [vmem:[#allocation5 + $0x570] sm:$0xff] }
 0x18a   :  { %v5545_v17 = vcombine.high %v297_v11, %v313_v12 }
 0x18c   :  { %2239 = vmatpush1.bf16.msra.mxu0 %v5538_v20  ;;  %2282 = vmatpush1.bf16.msra.mxu1 %v5540_v21  ;;  %v329_v20 = vld [vmem:[#allocation5 + $0x768] sm:$0xff] }
 0x18d   :  { %2240 = vmatprep.subr.bf16.mxu0 %v5571_v22  ;;  %2283 = vmatprep.subr.bf16.mxu1 %v5573_v23  ;;  %v345_v21 = vld [vmem:[#allocation5 + $0x7e8] sm:$0xff]  ;;  %v5542_v22 = vcombine.low %v296_v9, %v312_v10  ;;  %v5544_v23 = vcombine.low %v297_v11, %v313_v12  ;;  %v6745_v12 = vld [vmem:[#allocation7] sm:$0xff] }
 0x18e   :  { %v5577_v25 = vcombine.high %v329_v20, %v345_v21 }
 0x190   :  { %2241 = vmatpush1.bf16.msra.mxu0 %v5570_v28  ;;  %2284 = vmatpush1.bf16.msra.mxu1 %v5572_v29  ;;  %v107_v28 = vld [vmem:[#allocation5 + $0x78] sm:$0xff] }
 0x191   :  { %2312 = vmatprep.subr.bf16.mxu0 %v5351_v30  ;;  %2355 = vmatprep.subr.bf16.mxu1 %v5353_v32  ;;  %v123_v29 = vld [vmem:[#allocation5 + $0xf8] sm:$0xff]  ;;  %v5574_v30 = vcombine.low %v328_v18, %v344_v19  ;;  %v5576_v32 = vcombine.low %v329_v20, %v345_v21  ;;  %v298_v18 = vld [vmem:[#allocation5 + $0x670] sm:$0xff] }
 0x192   :  { %v5357_v34 = vcombine.high %v107_v28, %v123_v29  ;;  %v314_v19 = vld [vmem:[#allocation5 + $0x6f0] sm:$0xff]  ;;  %v299_v20 = vld [vmem:[#allocation5 + $0x678] sm:$0xff] }
 0x193   :  { %2259 = vmatmul.mubr.bf16.vlgmr.msra.gmra.mrb[20].mxu0 %v6707_v31  ;;  %2302 = vmatmul.mubr.bf16.vlgmr.msra.gmra.mrb[20].mxu1 %v6707_v31  ;;  %v315_v21 = vld [vmem:[#allocation5 + $0x6f8] sm:$0xff] }
 0x194   :  { %2313 = vmatpush1.bf16.msra.mxu0 %v5350_v37  ;;  %2356 = vmatpush1.bf16.msra.mxu1 %v5352_v3  ;;  %v139_v37 = vld [vmem:[#allocation5 + $0x178] sm:$0xff] }
 0x195   :  { %2314 = vmatprep.subr.bf16.mxu0 %v5383_v38  ;;  %2357 = vmatprep.subr.bf16.mxu1 %v5385_v4  ;;  %v155_v3 = vld [vmem:[#allocation5 + $0x1f8] sm:$0xff]  ;;  %v5354_v38 = vcombine.low %v106_v26, %v122_v27  ;;  %v5356_v4 = vcombine.low %v107_v28, %v123_v29  ;;  %v5547_v28 = vcombine.high %v298_v18, %v314_v19 }
 0x196   :  { %2344 = vmatprep.mubr.bf16.mxu0 %v6600_v15  ;;  %2387 = vmatprep.mubr.bf16.mxu1 %v6600_v15  ;;  %v5389_v40 = vcombine.high %v139_v37, %v155_v3  ;;  %v5549_v29 = vcombine.high %v299_v20, %v315_v21 }
 0x198   :  { %2315 = vmatpush1.bf16.msra.mxu0 %v5382_v43  ;;  %2358 = vmatpush1.bf16.msra.mxu1 %v5384_v44  ;;  %v171_v43 = vld [vmem:[#allocation5 + $0x278] sm:$0xff] }
 0x199   :  { %2316 = vmatprep.subr.bf16.mxu0 %v5415_v45  ;;  %2359 = vmatprep.subr.bf16.mxu1 %v5417_v46  ;;  %v187_v44 = vld [vmem:[#allocation5 + $0x2f8] sm:$0xff]  ;;  %v5386_v45 = vcombine.low %v138_v35, %v154_v36  ;;  %v5388_v46 = vcombine.low %v139_v37, %v155_v3 }
 0x19a   :  { %v5421_v48 = vcombine.high %v171_v43, %v187_v44  ;;  %v5420_v55 = vcombine.low %v171_v43, %v187_v44  ;;  %v331_v35 = vld [vmem:[#allocation5 + $0x778] sm:$0xff] }
 0x19b   :  { %v347_v36 = vld [vmem:[#allocation5 + $0x7f8] sm:$0xff] }
 0x19c   :  { %2317 = vmatpush1.bf16.msra.mxu0 %v5414_v51  ;;  %2360 = vmatpush1.bf16.msra.mxu1 %v5416_v52  ;;  %v203_v51 = vld [vmem:[#allocation5 + $0x378] sm:$0xff]  ;;  %v5581_v50 = vcombine.high %v331_v35, %v347_v36 }
 0x19d   :  { %2318 = vmatprep.subr.bf16.mxu0 %v5447_v53  ;;  %2361 = vmatprep.subr.bf16.mxu1 %v5449_v54  ;;  %v219_v52 = vld [vmem:[#allocation5 + $0x3f8] sm:$0xff]  ;;  %v356_v53 = vlaneseq  ;;  %v5418_v54 = vcombine.low %v170_v41, %v186_v42 }
 0x19e   :  { %v5453_v57 = vcombine.high %v203_v51, %v219_v52  ;;  %v5452_v0 = vcombine.low %v203_v51, %v219_v52 }
 0x1a0   :  { %2319 = vmatpush1.bf16.msra.mxu0 %v5446_v59  ;;  %2362 = vmatpush1.bf16.msra.mxu1 %v5448_v60  ;;  %v250_v59 = vld [vmem:[#allocation5 + $0x4f0] sm:$0xff]  ;;  %v235_v60 = vld [vmem:[#allocation5 + $0x478] sm:$0xff] }
 0x1a1   :  { %2320 = vmatprep.subr.bf16.mxu0 %v5479_v61  ;;  %2363 = vmatprep.subr.bf16.mxu1 %v5481_v62  ;;  %v251_v61 = vld [vmem:[#allocation5 + $0x4f8] sm:$0xff]  ;;  %v6737_v62 = vshrl.u32 %v356_v53, 7  ;;  %v5482_v10 = vcombine.low %v234_v58, %v250_v59 }
 0x1a2   :  { %v5485_v1 = vcombine.high %v235_v60, %v251_v61  ;;  %v5484_v11 = vcombine.low %v235_v60, %v251_v61 }
 0x1a3   :  { %v6743_v9 = vsub.s32 2, %v6737_v62 }
 0x1a4   :  { %2321 = vmatpush1.bf16.msra.mxu0 %v5478_v5  ;;  %2364 = vmatpush1.bf16.msra.mxu1 %v5480_v6  ;;  %v282_v5 = vld [vmem:[#allocation5 + $0x5f0] sm:$0xff]  ;;  %v267_v6 = vld [vmem:[#allocation5 + $0x578] sm:$0xff] }
 0x1a5   :  { %2322 = vmatprep.subr.bf16.mxu0 %v5511_v7  ;;  %2365 = vmatprep.subr.bf16.mxu1 %v5513_v8  ;;  %v283_v7 = vld [vmem:[#allocation5 + $0x5f8] sm:$0xff]  ;;  %v6740_v8 = vsub.s32 0, %v6737_v62 }
 0x1a8   :  { %2323 = vmatpush1.bf16.msra.mxu0 %v5510_v13  ;;  %2366 = vmatpush1.bf16.msra.mxu1 %v5512_v14  ;;  %v6748_v13 = vsub.s32 1, %v6737_v62  ;;  %v6751_v14 = vsub.s32 3, %v6737_v62 }
 0x1a9   :  { %2324 = vmatprep.subr.bf16.mxu0 %v5543_v16  ;;  %2367 = vmatprep.subr.bf16.mxu1 %v5545_v17  ;;  %v5515_v16 = vcombine.high %v266_v2, %v282_v5  ;;  %v5517_v17 = vcombine.high %v267_v6, %v283_v7 }
 0x1aa   :  { %v363_v26 = vrot.slane %v6745_v12, %v6748_v13  ;;  %v371_v27 = vrot.slane %v6745_v12, %v6751_v14 }
 0x1ac   :  { %2325 = vmatpush1.bf16.msra.mxu0 %v5542_v22  ;;  %2368 = vmatpush1.bf16.msra.mxu1 %v5544_v23  ;;  %v359_v22 = vrot.slane %v6745_v12, %v6740_v8  ;;  %v367_v23 = vrot.slane %v6745_v12, %v6743_v9 }
 0x1ad   :  { %2326 = vmatprep.subr.bf16.mxu0 %v5575_v24  ;;  %2369 = vmatprep.subr.bf16.mxu1 %v5577_v25  ;;  %v5514_v24 = vcombine.low %v266_v2, %v282_v5  ;;  %v5516_v25 = vcombine.low %v267_v6, %v283_v7  ;;  %v6207_v2 = vld [vmem:[#allocation8 + $0xc0] sm:$0xff]  }
 0x1ae   :  { %v6208_v7 = vld [vmem:[#allocation8] sm:$0xff]  }
 0x1b0   :  { %2327 = vmatpush1.bf16.msra.mxu0 %v5574_v30  ;;  %2370 = vmatpush1.bf16.msra.mxu1 %v5576_v32  ;;  %v330_v30 = vld [vmem:[#allocation5 + $0x770] sm:$0xff] }
 0x1b1   :  { %2398 = vmatprep.subr.bf16.mxu0 %v5355_v33  ;;  %2441 = vmatprep.subr.bf16.mxu1 %v5357_v34  ;;  %v346_v32 = vld [vmem:[#allocation5 + $0x7f0] sm:$0xff] }
 0x1b2   :  { %v5578_v53 = vcombine.low %v330_v30, %v346_v32 }
 0x1b3   :  { %2345 = vmatmul.mubr.bf16.vlgmr.msra.gmra.mrb[24].mxu0 %v6707_v31  ;;  %2388 = vmatmul.mubr.bf16.vlgmr.msra.gmra.mrb[24].mxu1 %v6707_v31 }
 0x1b4   :  { %2399 = vmatpush1.bf16.msra.mxu0 %v5354_v38  ;;  %2442 = vmatpush1.bf16.msra.mxu1 %v5356_v4 }
 0x1b5   :  { %2400 = vmatprep.subr.bf16.mxu0 %v5387_v39  ;;  %2443 = vmatprep.subr.bf16.mxu1 %v5389_v40  ;;  %v5546_v39 = vcombine.low %v298_v18, %v314_v19  ;;  %v5548_v40 = vcombine.low %v299_v20, %v315_v21  ;;  %v6213_v18 = vld [vmem:[#allocation8 + $0x88] sm:$0xff]   ;;  %v6214_v19 = vld [vmem:[#allocation8 + $0x50] sm:$0xff]  }
 0x1b6   :  { %2430 = vmatprep.mubr.bf16.mxu0 %v6600_v15  ;;  %2473 = vmatprep.mubr.bf16.mxu1 %v6600_v15  ;;  %v5483_v15 = vcombine.high %v234_v58, %v250_v59  ;;  %v6215_v20 = vld [vmem:[#allocation8 + $0xd0] sm:$0xff]  }
 0x1b7   :  { %v6216_v21 = vld [vmem:[#allocation8 + $0x10] sm:$0xff]  }
 0x1b8   :  { %2401 = vmatpush1.bf16.msra.mxu0 %v5386_v45  ;;  %2444 = vmatpush1.bf16.msra.mxu1 %v5388_v46  ;;  %v5579_v45 = vcombine.high %v330_v30, %v346_v32  ;;  %v6224_v30 = vld [vmem:[#allocation8 + $0x20] sm:$0xff]   ;;  %v6774_v32 = vsub.s32 5, %v6737_v62 }
 0x1b9   :  { %2402 = vmatprep.subr.bf16.mxu0 %v5419_v47  ;;  %2445 = vmatprep.subr.bf16.mxu1 %v5421_v48 }
 0x1bc   :  { %2403 = vmatpush1.bf16.msra.mxu0 %v5418_v54  ;;  %2446 = vmatpush1.bf16.msra.mxu1 %v5420_v55  ;;  %v5580_v54 = vcombine.low %v331_v35, %v347_v36  ;;  %v6226_v35 = vld [vmem:[#allocation8 + $0x68] sm:$0xff]  }
 0x1bd   :  { %2404 = vmatprep.subr.bf16.mxu0 %v5451_v56  ;;  %2447 = vmatprep.subr.bf16.mxu1 %v5453_v57  ;;  %v6227_v36 = vld [vmem:[#allocation8 + $0xe8] sm:$0xff]  }
 0x1c0   :  { %2405 = vmatpush1.bf16.msra.mxu0 %v5450_v63  ;;  %2448 = vmatpush1.bf16.msra.mxu1 %v5452_v0 }
 0x1c1   :  { %2406 = vmatprep.subr.bf16.mxu0 %v5483_v15  ;;  %2449 = vmatprep.subr.bf16.mxu1 %v5485_v1  ;;  %v6206_v1 = vld [vmem:[#allocation8 + $0x40] sm:$0xff]  }
 0x1c4   :  { %2407 = vmatpush1.bf16.msra.mxu0 %v5482_v10  ;;  %2450 = vmatpush1.bf16.msra.mxu1 %v5484_v11  ;;  %v6209_v10 = vld [vmem:[#allocation8 + $0x80] sm:$0xff]   ;;  %v6210_v11 = vld [vmem:[#allocation8 + $0x48] sm:$0xff]  }
 0x1c5   :  { %2408 = vmatprep.subr.bf16.mxu0 %v5515_v16  ;;  %2451 = vmatprep.subr.bf16.mxu1 %v5517_v17  ;;  %v6211_v16 = vld [vmem:[#allocation8 + $0xc8] sm:$0xff]  }
 0x1c6   :  { %v1830_v33 = vpop.f32.mrb[0].mxu0  ;;  %v1873_v34 = vpop.f32.mrb[0].mxu1  ;;  %v6212_v17 = vld [vmem:[#allocation8 + $0x8] sm:$0xff]  }
 0x1c7   :  { %v1831_v37 = vadd.f32 %v1830_v33, %v359_v22  ;;  %v1874_v3 = vadd.f32 %v1873_v34, %v367_v23  ;;  %v1832_v38 = vpop.f32.mrb[1].mxu0  ;;  %v1875_v4 = vpop.f32.mrb[1].mxu1  ;;  %v6777_v33 = vsub.s32 7, %v6737_v62  ;;  %v6225_v34 = vld [vmem:[#allocation8 + $0xa0] sm:$0xff]  }
 0x1c8   :  { %v1833_v41 = vadd.f32 %v1832_v38, %v363_v26  ;;  %v1876_v42 = vadd.f32 %v1875_v4, %v371_v27  ;;  %2409 = vmatpush1.bf16.msra.mxu0 %v5514_v24  ;;  %2452 = vmatpush1.bf16.msra.mxu1 %v5516_v25  ;;  %v1834_v43 = vpop.f32.mrb[2].mxu0  ;;  %v1877_v44 = vpop.f32.mrb[2].mxu1  ;;  %v6219_v24 = vld [vmem:[#allocation8 + $0xd8] sm:$0xff]   ;;  %v379_v38 = vrot.slane %v6745_v12, %v6774_v32  ;;  %v6228_v4 = vld [vmem:[#allocation8 + $0x28] sm:$0xff]  }
 0x1c9   :  { %v1835_v46 = vadd.f32 %v1834_v43, %v359_v22  ;;  %v1878_v47 = vadd.f32 %v1877_v44, %v367_v23  ;;  %v1836_v48 = vpop.f32.mrb[3].mxu0  ;;  %v1879_v49 = vpop.f32.mrb[3].mxu1  ;;  %2410 = vmatprep.subr.bf16.mxu0 %v5547_v28  ;;  %2453 = vmatprep.subr.bf16.mxu1 %v5549_v29  ;;  %v2484_v55 = vmax.f32 %v1831_v37, 0.0  ;;  %v2486_v56 = vmax.f32 %v1874_v3, 0.0  ;;  %v6217_v22 = vld [vmem:[#allocation8 + $0x90] sm:$0xff]   ;;  %v6218_v23 = vld [vmem:[#allocation8 + $0x58] sm:$0xff]  }
 0x1ca   :  { %v1837_v51 = vadd.f32 %v1836_v48, %v363_v26  ;;  %v1880_v52 = vadd.f32 %v1879_v49, %v371_v27  ;;  %v2485_v59 = vmax.f32 %v1833_v41, 0.0  ;;  %v2487_v60 = vmax.f32 %v1876_v42, 0.0  ;;  %v6221_v25 = vld [vmem:[#allocation8 + $0x98] sm:$0xff]   ;;  %v6222_v26 = vld [vmem:[#allocation8 + $0x60] sm:$0xff]   ;;  %v6231_v43 = vld [vmem:[#allocation8 + $0xf0] sm:$0xff]  }
 0x1cb   :  { %v2516_v57 = vmax.f32 %v1835_v46, 0.0  ;;  %v2518_v58 = vmax.f32 %v1878_v47, 0.0  ;;  %v6223_v27 = vld [vmem:[#allocation8 + $0xe0] sm:$0xff]   ;;  %v6768_v28 = vsub.s32 4, %v6737_v62  ;;  %v6771_v29 = vsub.s32 6, %v6737_v62 }
 0x1cc   :  { %v2517_v61 = vmax.f32 %v1837_v51, 0.0  ;;  %v2519_v63 = vmax.f32 %v1880_v52, 0.0  ;;  %2411 = vmatpush1.bf16.msra.mxu0 %v5546_v39  ;;  %2454 = vmatpush1.bf16.msra.mxu1 %v5548_v40  ;;  %v387_v62 = vrot.slane %v6745_v12, %v6777_v33  ;;  %v6229_v39 = vld [vmem:[#allocation8 + $0xa8] sm:$0xff]   ;;  %v6230_v40 = vld [vmem:[#allocation8 + $0x70] sm:$0xff]  }
 0x1cd   :  { %v6761_v0 = vpack.c.bf16 %v2516_v57, %v2484_v55  ;;  %v6763_v15 = vpack.c.bf16 %v2518_v58, %v2486_v56  ;;  %2412 = vmatprep.subr.bf16.mxu0 %v5579_v45  ;;  %2455 = vmatprep.subr.bf16.mxu1 %v5581_v50  ;;  %v375_v37 = vrot.slane %v6745_v12, %v6768_v28  ;;  %v6232_v52 = vld [vmem:[#allocation8 + $0x30] sm:$0xff]   ;;  %v6234_v57 = vld [vmem:[#allocation8 + $0x78] sm:$0xff]  }
 0x1ce   :  { %v2549_v5 = vpack.c.bf16 %v2517_v61, %v2485_v59  ;;  %v2551_v6 = vpack.c.bf16 %v2519_v63, %v2487_v60  ;;  %v383_v3 = vrot.slane %v6745_v12, %v6771_v29  ;;  %v6233_v56 = vld [vmem:[#allocation8 + $0xb0] sm:$0xff]   ;;  %v6235_v60 = vld [vmem:[#allocation8 + $0xf8] sm:$0xff]  }
 0x1d0   :  { %2413 = vmatpush1.bf16.msra.mxu0 %v5578_v53  ;;  %2456 = vmatpush1.bf16.msra.mxu1 %v5580_v54 }
 0x1d1   :  { %5843 = vmatprep.subr.bf16.mxu0 %v6206_v1  ;;  %5865 = vmatprep.subr.bf16.mxu1 %v6207_v2 }
 0x1d3   :  { %2431 = vmatmul.mubr.bf16.vlgmr.msra.gmra.mrb[28].mxu0 %v6707_v31  ;;  %2474 = vmatmul.mubr.bf16.vlgmr.msra.gmra.mrb[28].mxu1 %v6707_v31  ;;  %v6220_v31 = vld [vmem:[#allocation8 + $0x18] sm:$0xff]  }
 0x1d4   :  { %5844 = vmatpush3.bf16.msra.mxu0 %v6208_v7  ;;  %4667 = vmatprep.mubr.bf16.mxu0 %v2549_v5 }
 0x1d5   :  { %5866 = vmatpush3.bf16.msra.mxu1 %v6209_v10  ;;  %4708 = vmatprep.mubr.bf16.mxu1 %v2551_v6 }
 0x1d6   :  { %5845 = vmatprep.subr.bf16.mxu0 %v6210_v11  ;;  %5867 = vmatprep.subr.bf16.mxu1 %v6211_v16  ;;  %v6236_v11 = vld [vmem:[#allocation8 + $0x38] sm:$0xff]  }
 0x1d8   :  { %5846 = vmatpush3.bf16.msra.mxu0 %v6212_v17 }
 0x1d9   :  { %5868 = vmatpush3.bf16.msra.mxu1 %v6213_v18  ;;  %5847 = vmatprep.subr.bf16.mxu0 %v6214_v19  ;;  %v6237_v18 = vld [vmem:[#allocation8 + $0xb8] sm:$0xff]   ;;  %v6238_v19 = vld [vmem:[#allocation8 + $0x140] sm:$0xff]  }
 0x1da   :  { %5869 = vmatprep.subr.bf16.mxu1 %v6215_v20 }
 0x1dc   :  { %5848 = vmatpush3.bf16.msra.mxu0 %v6216_v21 }
 0x1dd   :  { %5870 = vmatpush3.bf16.msra.mxu1 %v6217_v22  ;;  %5849 = vmatprep.subr.bf16.mxu0 %v6218_v23  ;;  %v6239_v22 = vld [vmem:[#allocation8 + $0x1c0] sm:$0xff]  }
 0x1de   :  { %5871 = vmatprep.subr.bf16.mxu1 %v6219_v24  ;;  %v6240_v23 = vld [vmem:[#allocation8 + $0x100] sm:$0xff]  }
 0x1df   :  { %v6241_v24 = vld [vmem:[#allocation8 + $0x180] sm:$0xff]  }
 0x1e0   :  { %5850 = vmatpush3.bf16.msra.mxu0 %v6220_v31  ;;  %v6242_v31 = vld [vmem:[#allocation8 + $0x148] sm:$0xff]  }
 0x1e1   :  { %5872 = vmatpush3.bf16.msra.mxu1 %v6221_v25  ;;  %5851 = vmatprep.subr.bf16.mxu0 %v6222_v26  ;;  %v6243_v25 = vld [vmem:[#allocation8 + $0x1c8] sm:$0xff]  }
 0x1e2   :  { %5873 = vmatprep.subr.bf16.mxu1 %v6223_v27  ;;  %v6244_v26 = vld [vmem:[#allocation8 + $0x108] sm:$0xff]  }
 0x1e3   :  { %v6245_v27 = vld [vmem:[#allocation8 + $0x188] sm:$0xff]  }
 0x1e4   :  { %5852 = vmatpush3.bf16.msra.mxu0 %v6224_v30  ;;  %v6246_v30 = vld [vmem:[#allocation8 + $0x150] sm:$0xff]  }
 0x1e5   :  { %5874 = vmatpush3.bf16.msra.mxu1 %v6225_v34  ;;  %5853 = vmatprep.subr.bf16.mxu0 %v6226_v35  ;;  %v6247_v34 = vld [vmem:[#allocation8 + $0x1d0] sm:$0xff]  }
 0x1e6   :  { %v1916_v41 = vpop.f32.mrb[4].mxu0  ;;  %v1959_v42 = vpop.f32.mrb[4].mxu1  ;;  %5875 = vmatprep.subr.bf16.mxu1 %v6227_v36  ;;  %v6248_v35 = vld [vmem:[#allocation8 + $0x110] sm:$0xff]  }
 0x1e7   :  { %v1917_v44 = vadd.f32 %v1916_v41, %v375_v37  ;;  %v1960_v45 = vadd.f32 %v1959_v42, %v383_v3  ;;  %v1918_v46 = vpop.f32.mrb[5].mxu0  ;;  %v1961_v47 = vpop.f32.mrb[5].mxu1  ;;  %v6249_v36 = vld [vmem:[#allocation8 + $0x190] sm:$0xff]   ;;  %v6258_v41 = vld [vmem:[#allocation8 + $0x168] sm:$0xff]  }
 0x1e8   :  { %v1919_v48 = vadd.f32 %v1918_v46, %v379_v38  ;;  %v1962_v49 = vadd.f32 %v1961_v47, %v387_v62  ;;  %v1920_v50 = vpop.f32.mrb[6].mxu0  ;;  %v1963_v51 = vpop.f32.mrb[6].mxu1  ;;  %5854 = vmatpush3.bf16.msra.mxu0 %v6228_v4  ;;  %v6256_v4 = vld [vmem:[#allocation8 + $0x120] sm:$0xff]   ;;  %v6259_v42 = vld [vmem:[#allocation8 + $0x1e8] sm:$0xff]  }
 0x1e9   :  { %v1921_v12 = vadd.f32 %v1920_v50, %v375_v37  ;;  %v1964_v53 = vadd.f32 %v1963_v51, %v383_v3  ;;  %5876 = vmatpush3.bf16.msra.mxu1 %v6229_v39  ;;  %v1922_v54 = vpop.f32.mrb[7].mxu0  ;;  %v1965_v55 = vpop.f32.mrb[7].mxu1  ;;  %5855 = vmatprep.subr.bf16.mxu0 %v6230_v40  ;;  %v2488_v61 = vmax.f32 %v1917_v44, 0.0  ;;  %v2490_v63 = vmax.f32 %v1960_v45, 0.0  ;;  %v6250_v37 = vld [vmem:[#allocation8 + $0x158] sm:$0xff]   ;;  %v6793_v39 = vld [vmem:[#allocation7 + $0x8] sm:$0xff] }
 0x1ea   :  { %v1923_v58 = vadd.f32 %v1922_v54, %v379_v38  ;;  %v1966_v59 = vadd.f32 %v1965_v55, %v387_v62  ;;  %5877 = vmatprep.subr.bf16.mxu1 %v6231_v43  ;;  %v2489_v5 = vmax.f32 %v1919_v48, 0.0  ;;  %v2491_v6 = vmax.f32 %v1962_v49, 0.0  ;;  %v6253_v3 = vld [vmem:[#allocation8 + $0x198] sm:$0xff]   ;;  %v6254_v38 = vld [vmem:[#allocation8 + $0x160] sm:$0xff]   ;;  %v6260_v47 = vld [vmem:[#allocation8 + $0x128] sm:$0xff]  }
 0x1eb   :  { %v2520_v1 = vmax.f32 %v1921_v12, 0.0  ;;  %v2522_v2 = vmax.f32 %v1964_v53, 0.0  ;;  %v6255_v62 = vld [vmem:[#allocation8 + $0x1e0] sm:$0xff]   ;;  %v391_v43 = vrot.slane %v6793_v39, %v6740_v8  ;;  %v399_v44 = vrot.slane %v6793_v39, %v6743_v9  ;;  %v6261_v48 = vld [vmem:[#allocation8 + $0x1a8] sm:$0xff]   ;;  %v6262_v49 = vld [vmem:[#allocation8 + $0x170] sm:$0xff]  }
 0x1ec   :  { %v2521_v7 = vmax.f32 %v1923_v58, 0.0  ;;  %v2523_v10 = vmax.f32 %v1966_v59, 0.0  ;;  %5856 = vmatpush3.bf16.msra.mxu0 %v6232_v52  ;;  %v6257_v40 = vld [vmem:[#allocation8 + $0x1a0] sm:$0xff]   ;;  %v395_v45 = vrot.slane %v6793_v39, %v6748_v13  ;;  %v403_v46 = vrot.slane %v6793_v39, %v6751_v14  ;;  %v6263_v52 = vld [vmem:[#allocation8 + $0x1f0] sm:$0xff]  }
 0x1ed   :  { %v6787_v16 = vpack.c.bf16 %v2520_v1, %v2488_v61  ;;  %v6789_v17 = vpack.c.bf16 %v2522_v2, %v2490_v63  ;;  %5878 = vmatpush3.bf16.msra.mxu1 %v6233_v56  ;;  %5857 = vmatprep.subr.bf16.mxu0 %v6234_v57 }
 0x1ee   :  { %v2553_v20 = vpack.c.bf16 %v2521_v7, %v2489_v5  ;;  %v2555_v21 = vpack.c.bf16 %v2523_v10, %v2491_v6  ;;  %5879 = vmatprep.subr.bf16.mxu1 %v6235_v60  ;;  %v6264_v60 = vld [vmem:[#allocation8 + $0x130] sm:$0xff]   ;;  %v6266_v6 = vld [vmem:[#allocation8 + $0x178] sm:$0xff]  }
 0x1ef   :  { %v6265_v5 = vld [vmem:[#allocation8 + $0x1b0] sm:$0xff]  }
 0x1f0   :  { %5858 = vmatpush3.bf16.msra.mxu0 %v6236_v11  ;;  %v6267_v11 = vld [vmem:[#allocation8 + $0x1f8] sm:$0xff]  }
 0x1f1   :  { %5880 = vmatpush3.bf16.msra.mxu1 %v6237_v18  ;;  %5887 = vmatprep.subr.bf16.mxu0 %v6238_v19 }
 0x1f2   :  { %5909 = vmatprep.subr.bf16.mxu1 %v6239_v22 }
 0x1f3   :  { %4668 = vmatmul.mubr.bf16.vlgmr.msra.gmra.mrb[32].mxu0 %v6761_v0  ;;  %v6251_v0 = vld [vmem:[#allocation8 + $0x1d8] sm:$0xff]  }
 0x1f4   :  { %4709 = vmatmul.mubr.bf16.vlgmr.msra.gmra.mrb[32].mxu1 %v6763_v15  ;;  %5888 = vmatpush3.bf16.msra.mxu0 %v6240_v23  ;;  %v6252_v15 = vld [vmem:[#allocation8 + $0x118] sm:$0xff]  }
 0x1f5   :  { %4749 = vmatprep.mubr.bf16.mxu0 %v2553_v20  ;;  %5910 = vmatpush3.bf16.msra.mxu1 %v6241_v24 }
 0x1f6   :  { %4790 = vmatprep.mubr.bf16.mxu1 %v2555_v21  ;;  %5889 = vmatprep.subr.bf16.mxu0 %v6242_v31 }
 0x1f7   :  { %5911 = vmatprep.subr.bf16.mxu1 %v6243_v25  ;;  %v6268_v25 = vld [vmem:[#allocation8 + $0x138] sm:$0xff]  }
 0x1f8   :  { %5890 = vmatpush3.bf16.msra.mxu0 %v6244_v26 }
 0x1f9   :  { %5912 = vmatpush3.bf16.msra.mxu1 %v6245_v27  ;;  %5891 = vmatprep.subr.bf16.mxu0 %v6246_v30  ;;  %v6269_v30 = vld [vmem:[#allocation8 + $0x1b8] sm:$0xff]  }
 0x1fa   :  { %5913 = vmatprep.subr.bf16.mxu1 %v6247_v34  ;;  %v6270_v34 = vld [vmem:[#allocation8 + $0x240] sm:$0xff]  }
 0x1fc   :  { %5892 = vmatpush3.bf16.msra.mxu0 %v6248_v35 }
 0x1fd   :  { %5914 = vmatpush3.bf16.msra.mxu1 %v6249_v36  ;;  %5893 = vmatprep.subr.bf16.mxu0 %v6250_v37  ;;  %v6271_v37 = vld [vmem:[#allocation8 + $0x2c0] sm:$0xff]  }
 0x1fe   :  { %5915 = vmatprep.subr.bf16.mxu1 %v6251_v0  ;;  %v6272_v0 = vld [vmem:[#allocation8 + $0x200] sm:$0xff]  }
 0x200   :  { %5894 = vmatpush3.bf16.msra.mxu0 %v6252_v15  ;;  %v6273_v15 = vld [vmem:[#allocation8 + $0x280] sm:$0xff]  }
 0x201   :  { %5916 = vmatpush3.bf16.msra.mxu1 %v6253_v3  ;;  %5895 = vmatprep.subr.bf16.mxu0 %v6254_v38  ;;  %v6274_v3 = vld [vmem:[#allocation8 + $0x248] sm:$0xff]  }
 0x202   :  { %5917 = vmatprep.subr.bf16.mxu1 %v6255_v62  ;;  %v6275_v38 = vld [vmem:[#allocation8 + $0x2c8] sm:$0xff]  }
 0x203   :  { %v6276_v62 = vld [vmem:[#allocation8 + $0x208] sm:$0xff]  }
 0x204   :  { %5896 = vmatpush3.bf16.msra.mxu0 %v6256_v4  ;;  %v6277_v4 = vld [vmem:[#allocation8 + $0x288] sm:$0xff]  }
 0x205   :  { %5918 = vmatpush3.bf16.msra.mxu1 %v6257_v40  ;;  %5897 = vmatprep.subr.bf16.mxu0 %v6258_v41  ;;  %v6278_v40 = vld [vmem:[#allocation8 + $0x250] sm:$0xff]  }
 0x206   :  { %v2002_v50 = vpop.f32.mrb[8].mxu0  ;;  %v2045_v51 = vpop.f32.mrb[8].mxu1  ;;  %5919 = vmatprep.subr.bf16.mxu1 %v6259_v42  ;;  %v6279_v41 = vld [vmem:[#allocation8 + $0x2d0] sm:$0xff]  }
 0x207   :  { %v2003_v12 = vadd.f32 %v2002_v50, %v391_v43  ;;  %v2046_v53 = vadd.f32 %v2045_v51, %v399_v44  ;;  %v2004_v54 = vpop.f32.mrb[9].mxu0  ;;  %v2047_v55 = vpop.f32.mrb[9].mxu1  ;;  %v6280_v42 = vld [vmem:[#allocation8 + $0x210] sm:$0xff]   ;;  %v6290_v50 = vld [vmem:[#allocation8 + $0x268] sm:$0xff]  }
 0x208   :  { %v2005_v56 = vadd.f32 %v2004_v54, %v395_v45  ;;  %v2048_v57 = vadd.f32 %v2047_v55, %v403_v46  ;;  %v2006_v58 = vpop.f32.mrb[10].mxu0  ;;  %v2049_v59 = vpop.f32.mrb[10].mxu1  ;;  %5898 = vmatpush3.bf16.msra.mxu0 %v6260_v47  ;;  %v6287_v47 = vld [vmem:[#allocation8 + $0x2e0] sm:$0xff]   ;;  %v6291_v51 = vld [vmem:[#allocation8 + $0x2e8] sm:$0xff]   ;;  %v419_v54 = vrot.slane %v6793_v39, %v6777_v33 }
 0x209   :  { %v2007_v61 = vadd.f32 %v2006_v58, %v391_v43  ;;  %v2050_v63 = vadd.f32 %v2049_v59, %v399_v44  ;;  %5920 = vmatpush3.bf16.msra.mxu1 %v6261_v48  ;;  %v2008_v1 = vpop.f32.mrb[11].mxu0  ;;  %v2051_v2 = vpop.f32.mrb[11].mxu1  ;;  %5899 = vmatprep.subr.bf16.mxu0 %v6262_v49  ;;  %v2492_v18 = vmax.f32 %v2003_v12, 0.0  ;;  %v2494_v19 = vmax.f32 %v2046_v53, 0.0  ;;  %v6281_v43 = vld [vmem:[#allocation8 + $0x290] sm:$0xff]   ;;  %v6282_v44 = vld [vmem:[#allocation8 + $0x258] sm:$0xff]  }
 0x20a   :  { %v2009_v7 = vadd.f32 %v2008_v1, %v395_v45  ;;  %v2052_v10 = vadd.f32 %v2051_v2, %v403_v46  ;;  %5921 = vmatprep.subr.bf16.mxu1 %v6263_v52  ;;  %v2493_v22 = vmax.f32 %v2005_v56, 0.0  ;;  %v2495_v23 = vmax.f32 %v2048_v57, 0.0  ;;  %v6285_v45 = vld [vmem:[#allocation8 + $0x298] sm:$0xff]   ;;  %v6286_v46 = vld [vmem:[#allocation8 + $0x260] sm:$0xff]   ;;  %v6292_v55 = vld [vmem:[#allocation8 + $0x228] sm:$0xff]  }
 0x20b   :  { %v2524_v20 = vmax.f32 %v2007_v61, 0.0  ;;  %v2526_v21 = vmax.f32 %v2050_v63, 0.0  ;;  %v6288_v48 = vld [vmem:[#allocation8 + $0x220] sm:$0xff]   ;;  %v407_v52 = vrot.slane %v6793_v39, %v6768_v28  ;;  %v415_v12 = vrot.slane %v6793_v39, %v6771_v29  ;;  %v6293_v56 = vld [vmem:[#allocation8 + $0x2a8] sm:$0xff]   ;;  %v6294_v57 = vld [vmem:[#allocation8 + $0x270] sm:$0xff]  }
 0x20c   :  { %v2525_v24 = vmax.f32 %v2009_v7, 0.0  ;;  %v2527_v31 = vmax.f32 %v2052_v10, 0.0  ;;  %5900 = vmatpush3.bf16.msra.mxu0 %v6264_v60  ;;  %v6289_v49 = vld [vmem:[#allocation8 + $0x2a0] sm:$0xff]   ;;  %v411_v53 = vrot.slane %v6793_v39, %v6774_v32  ;;  %v6295_v60 = vld [vmem:[#allocation8 + $0x2f0] sm:$0xff]  }
 0x20d   :  { %v6803_v26 = vpack.c.bf16 %v2524_v20, %v2492_v18  ;;  %v6805_v27 = vpack.c.bf16 %v2526_v21, %v2494_v19  ;;  %5922 = vmatpush3.bf16.msra.mxu1 %v6265_v5  ;;  %5901 = vmatprep.subr.bf16.mxu0 %v6266_v6  ;;  %v6297_v21 = vld [vmem:[#allocation8 + $0x2b0] sm:$0xff]  }
 0x20e   :  { %v2557_v35 = vpack.c.bf16 %v2525_v24, %v2493_v22  ;;  %v2559_v36 = vpack.c.bf16 %v2527_v31, %v2495_v23  ;;  %5923 = vmatprep.subr.bf16.mxu1 %v6267_v11  ;;  %v6296_v11 = vld [vmem:[#allocation8 + $0x230] sm:$0xff]   ;;  %v6298_v22 = vld [vmem:[#allocation8 + $0x278] sm:$0xff]  }
 0x20f   :  { %v6299_v31 = vld [vmem:[#allocation8 + $0x2f8] sm:$0xff]  }
 0x210   :  { %5902 = vmatpush3.bf16.msra.mxu0 %v6268_v25 }
 0x211   :  { %5924 = vmatpush3.bf16.msra.mxu1 %v6269_v30  ;;  %5931 = vmatprep.subr.bf16.mxu0 %v6270_v34 }
 0x212   :  { %5953 = vmatprep.subr.bf16.mxu1 %v6271_v37 }
 0x213   :  { %4750 = vmatmul.mubr.bf16.vlgmr.msra.gmra.mrb[36].mxu0 %v6787_v16  ;;  %v6283_v16 = vld [vmem:[#allocation8 + $0x2d8] sm:$0xff]  }
 0x214   :  { %4791 = vmatmul.mubr.bf16.vlgmr.msra.gmra.mrb[36].mxu1 %v6789_v17  ;;  %5932 = vmatpush3.bf16.msra.mxu0 %v6272_v0  ;;  %v6284_v17 = vld [vmem:[#allocation8 + $0x218] sm:$0xff]  }
 0x215   :  { %4831 = vmatprep.mubr.bf16.mxu0 %v2557_v35  ;;  %5954 = vmatpush3.bf16.msra.mxu1 %v6273_v15 }
 0x216   :  { %4872 = vmatprep.mubr.bf16.mxu1 %v2559_v36  ;;  %5933 = vmatprep.subr.bf16.mxu0 %v6274_v3  ;;  %v6300_v3 = vld [vmem:[#allocation8 + $0x238] sm:$0xff]  }
 0x217   :  { %5955 = vmatprep.subr.bf16.mxu1 %v6275_v38 }
 0x218   :  { %5934 = vmatpush3.bf16.msra.mxu0 %v6276_v62 }
 0x219   :  { %5956 = vmatpush3.bf16.msra.mxu1 %v6277_v4  ;;  %5935 = vmatprep.subr.bf16.mxu0 %v6278_v40  ;;  %v6301_v4 = vld [vmem:[#allocation8 + $0x2b8] sm:$0xff]   ;;  %v6302_v40 = vld [vmem:[#allocation8 + $0x340] sm:$0xff]  }
 0x21a   :  { %5957 = vmatprep.subr.bf16.mxu1 %v6279_v41 }
 0x21c   :  { %5936 = vmatpush3.bf16.msra.mxu0 %v6280_v42 }
 0x21d   :  { %5958 = vmatpush3.bf16.msra.mxu1 %v6281_v43  ;;  %5937 = vmatprep.subr.bf16.mxu0 %v6282_v44  ;;  %v6303_v43 = vld [vmem:[#allocation8 + $0x3c0] sm:$0xff]  }
 0x21e   :  { %5959 = vmatprep.subr.bf16.mxu1 %v6283_v16  ;;  %v6304_v44 = vld [vmem:[#allocation8 + $0x300] sm:$0xff]  }
 0x21f   :  { %v6305_v16 = vld [vmem:[#allocation8 + $0x380] sm:$0xff]  }
 0x220   :  { %5938 = vmatpush3.bf16.msra.mxu0 %v6284_v17  ;;  %v6306_v17 = vld [vmem:[#allocation8 + $0x348] sm:$0xff]  }
 0x221   :  { %5960 = vmatpush3.bf16.msra.mxu1 %v6285_v45  ;;  %5939 = vmatprep.subr.bf16.mxu0 %v6286_v46  ;;  %v6307_v45 = vld [vmem:[#allocation8 + $0x3c8] sm:$0xff]  }
 0x222   :  { %5961 = vmatprep.subr.bf16.mxu1 %v6287_v47  ;;  %v6308_v46 = vld [vmem:[#allocation8 + $0x308] sm:$0xff]  }
 0x223   :  { %v6309_v47 = vld [vmem:[#allocation8 + $0x388] sm:$0xff]  }
 0x224   :  { %5940 = vmatpush3.bf16.msra.mxu0 %v6288_v48  ;;  %v6310_v48 = vld [vmem:[#allocation8 + $0x350] sm:$0xff]  }
 0x225   :  { %5962 = vmatpush3.bf16.msra.mxu1 %v6289_v49  ;;  %5941 = vmatprep.subr.bf16.mxu0 %v6290_v50  ;;  %v6311_v49 = vld [vmem:[#allocation8 + $0x3d0] sm:$0xff]  }
 0x226   :  { %v2088_v58 = vpop.f32.mrb[12].mxu0  ;;  %v2131_v59 = vpop.f32.mrb[12].mxu1  ;;  %5963 = vmatprep.subr.bf16.mxu1 %v6291_v51  ;;  %v6312_v50 = vld [vmem:[#allocation8 + $0x310] sm:$0xff]  }
 0x227   :  { %v2089_v61 = vadd.f32 %v2088_v58, %v407_v52  ;;  %v2132_v63 = vadd.f32 %v2131_v59, %v415_v12  ;;  %v2090_v1 = vpop.f32.mrb[13].mxu0  ;;  %v2133_v2 = vpop.f32.mrb[13].mxu1  ;;  %v6313_v51 = vld [vmem:[#allocation8 + $0x390] sm:$0xff]   ;;  %v6322_v58 = vld [vmem:[#allocation8 + $0x368] sm:$0xff]  }
 0x228   :  { %v2091_v5 = vadd.f32 %v2090_v1, %v411_v53  ;;  %v2134_v6 = vadd.f32 %v2133_v2, %v419_v54  ;;  %v2092_v7 = vpop.f32.mrb[14].mxu0  ;;  %v2135_v10 = vpop.f32.mrb[14].mxu1  ;;  %5942 = vmatpush3.bf16.msra.mxu0 %v6292_v55  ;;  %v6320_v55 = vld [vmem:[#allocation8 + $0x320] sm:$0xff]   ;;  %v6323_v59 = vld [vmem:[#allocation8 + $0x3e8] sm:$0xff]  }
 0x229   :  { %v2093_v39 = vadd.f32 %v2092_v7, %v407_v52  ;;  %v2136_v18 = vadd.f32 %v2135_v10, %v415_v12  ;;  %5964 = vmatpush3.bf16.msra.mxu1 %v6293_v56  ;;  %v2094_v19 = vpop.f32.mrb[15].mxu0  ;;  %v2137_v20 = vpop.f32.mrb[15].mxu1  ;;  %5943 = vmatprep.subr.bf16.mxu0 %v6294_v57  ;;  %v2496_v25 = vmax.f32 %v2089_v61, 0.0  ;;  %v2498_v30 = vmax.f32 %v2132_v63, 0.0  ;;  %v6314_v52 = vld [vmem:[#allocation8 + $0x358] sm:$0xff]   ;;  %v6823_v56 = vld [vmem:[#allocation7 + $0x10] sm:$0xff] }
 0x22a   :  { %v2095_v23 = vadd.f32 %v2094_v19, %v411_v53  ;;  %v2138_v24 = vadd.f32 %v2137_v20, %v419_v54  ;;  %5965 = vmatprep.subr.bf16.mxu1 %v6295_v60  ;;  %v2497_v36 = vmax.f32 %v2091_v5, 0.0  ;;  %v2499_v37 = vmax.f32 %v2134_v6, 0.0  ;;  %v6317_v12 = vld [vmem:[#allocation8 + $0x398] sm:$0xff]   ;;  %v6318_v53 = vld [vmem:[#allocation8 + $0x360] sm:$0xff]   ;;  %v6324_v2 = vld [vmem:[#allocation8 + $0x328] sm:$0xff]  }
 0x22b   :  { %v2528_v34 = vmax.f32 %v2093_v39, 0.0  ;;  %v2530_v35 = vmax.f32 %v2136_v18, 0.0  ;;  %v6319_v54 = vld [vmem:[#allocation8 + $0x3e0] sm:$0xff]   ;;  %v423_v60 = vrot.slane %v6823_v56, %v6740_v8  ;;  %v431_v61 = vrot.slane %v6823_v56, %v6743_v9  ;;  %v6325_v5 = vld [vmem:[#allocation8 + $0x3a8] sm:$0xff]   ;;  %v6326_v6 = vld [vmem:[#allocation8 + $0x370] sm:$0xff]  }
 0x22c   :  { %v2529_v0 = vmax.f32 %v2095_v23, 0.0  ;;  %v2531_v15 = vmax.f32 %v2138_v24, 0.0  ;;  %5944 = vmatpush3.bf16.msra.mxu0 %v6296_v11  ;;  %v6321_v57 = vld [vmem:[#allocation8 + $0x3a0] sm:$0xff]   ;;  %v427_v63 = vrot.slane %v6823_v56, %v6748_v13  ;;  %v435_v1 = vrot.slane %v6823_v56, %v6751_v14  ;;  %v6327_v11 = vld [vmem:[#allocation8 + $0x3f0] sm:$0xff]  }
 0x22d   :  { %v6817_v38 = vpack.c.bf16 %v2528_v34, %v2496_v25  ;;  %v6819_v62 = vpack.c.bf16 %v2530_v35, %v2498_v30  ;;  %5966 = vmatpush3.bf16.msra.mxu1 %v6297_v21  ;;  %5945 = vmatprep.subr.bf16.mxu0 %v6298_v22 }
 0x22e   :  { %v2561_v41 = vpack.c.bf16 %v2529_v0, %v2497_v36  ;;  %v2563_v42 = vpack.c.bf16 %v2531_v15, %v2499_v37  ;;  %5967 = vmatprep.subr.bf16.mxu1 %v6299_v31  ;;  %v6328_v31 = vld [vmem:[#allocation8 + $0x330] sm:$0xff]   ;;  %v6330_v37 = vld [vmem:[#allocation8 + $0x378] sm:$0xff]  }
 0x22f   :  { %v6329_v36 = vld [vmem:[#allocation8 + $0x3b0] sm:$0xff]  }
 0x230   :  { %5946 = vmatpush3.bf16.msra.mxu0 %v6300_v3  ;;  %v6331_v3 = vld [vmem:[#allocation8 + $0x3f8] sm:$0xff]  }
 0x231   :  { %5968 = vmatpush3.bf16.msra.mxu1 %v6301_v4  ;;  %5975 = vmatprep.subr.bf16.mxu0 %v6302_v40 }
 0x232   :  { %5997 = vmatprep.subr.bf16.mxu1 %v6303_v43 }
 0x233   :  { %4832 = vmatmul.mubr.bf16.vlgmr.msra.gmra.mrb[40].mxu0 %v6803_v26  ;;  %v6315_v26 = vld [vmem:[#allocation8 + $0x3d8] sm:$0xff]  }
 0x234   :  { %4873 = vmatmul.mubr.bf16.vlgmr.msra.gmra.mrb[40].mxu1 %v6805_v27  ;;  %5976 = vmatpush3.bf16.msra.mxu0 %v6304_v44  ;;  %v6316_v27 = vld [vmem:[#allocation8 + $0x318] sm:$0xff]  }
 0x235   :  { %4913 = vmatprep.mubr.bf16.mxu0 %v2561_v41  ;;  %5998 = vmatpush3.bf16.msra.mxu1 %v6305_v16 }
 0x236   :  { %4954 = vmatprep.mubr.bf16.mxu1 %v2563_v42  ;;  %5977 = vmatprep.subr.bf16.mxu0 %v6306_v17 }
 0x237   :  { %5999 = vmatprep.subr.bf16.mxu1 %v6307_v45  ;;  %v6332_v45 = vld [vmem:[#allocation8 + $0x338] sm:$0xff]  }
 0x238   :  { %5978 = vmatpush3.bf16.msra.mxu0 %v6308_v46 }
 0x239   :  { %6000 = vmatpush3.bf16.msra.mxu1 %v6309_v47  ;;  %5979 = vmatprep.subr.bf16.mxu0 %v6310_v48  ;;  %v6333_v48 = vld [vmem:[#allocation8 + $0x3b8] sm:$0xff]  }
 0x23a   :  { %6001 = vmatprep.subr.bf16.mxu1 %v6311_v49  ;;  %v6334_v49 = vld [vmem:[#allocation8 + $0x440] sm:$0xff]  }
 0x23c   :  { %5980 = vmatpush3.bf16.msra.mxu0 %v6312_v50 }
 0x23d   :  { %6002 = vmatpush3.bf16.msra.mxu1 %v6313_v51  ;;  %5981 = vmatprep.subr.bf16.mxu0 %v6314_v52  ;;  %v6335_v52 = vld [vmem:[#allocation8 + $0x4c0] sm:$0xff]  }
 0x23e   :  { %6003 = vmatprep.subr.bf16.mxu1 %v6315_v26  ;;  %v6336_v26 = vld [vmem:[#allocation8 + $0x400] sm:$0xff]  }
 0x240   :  { %5982 = vmatpush3.bf16.msra.mxu0 %v6316_v27  ;;  %v6337_v27 = vld [vmem:[#allocation8 + $0x480] sm:$0xff]  }
 0x241   :  { %6004 = vmatpush3.bf16.msra.mxu1 %v6317_v12  ;;  %5983 = vmatprep.subr.bf16.mxu0 %v6318_v53  ;;  %v6338_v12 = vld [vmem:[#allocation8 + $0x448] sm:$0xff]  }
 0x242   :  { %6005 = vmatprep.subr.bf16.mxu1 %v6319_v54  ;;  %v6339_v53 = vld [vmem:[#allocation8 + $0x4c8] sm:$0xff]  }
 0x243   :  { %v6340_v54 = vld [vmem:[#allocation8 + $0x408] sm:$0xff]  }
 0x244   :  { %5984 = vmatpush3.bf16.msra.mxu0 %v6320_v55  ;;  %v6341_v55 = vld [vmem:[#allocation8 + $0x488] sm:$0xff]  }
 0x245   :  { %6006 = vmatpush3.bf16.msra.mxu1 %v6321_v57  ;;  %5985 = vmatprep.subr.bf16.mxu0 %v6322_v58  ;;  %v6342_v57 = vld [vmem:[#allocation8 + $0x450] sm:$0xff]  }
 0x246   :  { %v2174_v7 = vpop.f32.mrb[16].mxu0  ;;  %v2217_v10 = vpop.f32.mrb[16].mxu1  ;;  %6007 = vmatprep.subr.bf16.mxu1 %v6323_v59  ;;  %v6343_v58 = vld [vmem:[#allocation8 + $0x4d0] sm:$0xff]  }
 0x247   :  { %v2175_v39 = vadd.f32 %v2174_v7, %v423_v60  ;;  %v2218_v18 = vadd.f32 %v2217_v10, %v431_v61  ;;  %v2176_v19 = vpop.f32.mrb[17].mxu0  ;;  %v2219_v20 = vpop.f32.mrb[17].mxu1  ;;  %v6344_v59 = vld [vmem:[#allocation8 + $0x410] sm:$0xff]   ;;  %v6354_v7 = vld [vmem:[#allocation8 + $0x468] sm:$0xff]  }
 0x248   :  { %v2177_v21 = vadd.f32 %v2176_v19, %v427_v63  ;;  %v2220_v22 = vadd.f32 %v2219_v20, %v435_v1  ;;  %v2178_v23 = vpop.f32.mrb[18].mxu0  ;;  %v2221_v24 = vpop.f32.mrb[18].mxu1  ;;  %5986 = vmatpush3.bf16.msra.mxu0 %v6324_v2  ;;  %v6351_v2 = vld [vmem:[#allocation8 + $0x4e0] sm:$0xff]   ;;  %v6355_v10 = vld [vmem:[#allocation8 + $0x4e8] sm:$0xff]   ;;  %v451_v19 = vrot.slane %v6823_v56, %v6777_v33 }
 0x249   :  { %v2179_v25 = vadd.f32 %v2178_v23, %v423_v60  ;;  %v2222_v30 = vadd.f32 %v2221_v24, %v431_v61  ;;  %6008 = vmatpush3.bf16.msra.mxu1 %v6325_v5  ;;  %v2180_v34 = vpop.f32.mrb[19].mxu0  ;;  %v2223_v35 = vpop.f32.mrb[19].mxu1  ;;  %5987 = vmatprep.subr.bf16.mxu0 %v6326_v6  ;;  %v2500_v4 = vmax.f32 %v2175_v39, 0.0  ;;  %v2502_v40 = vmax.f32 %v2218_v18, 0.0  ;;  %v6345_v60 = vld [vmem:[#allocation8 + $0x490] sm:$0xff]   ;;  %v6346_v61 = vld [vmem:[#allocation8 + $0x458] sm:$0xff]  }
 0x24a   :  { %v2181_v0 = vadd.f32 %v2180_v34, %v427_v63  ;;  %v2224_v15 = vadd.f32 %v2223_v35, %v435_v1  ;;  %6009 = vmatprep.subr.bf16.mxu1 %v6327_v11  ;;  %v2501_v43 = vmax.f32 %v2177_v21, 0.0  ;;  %v2503_v44 = vmax.f32 %v2220_v22, 0.0  ;;  %v6349_v63 = vld [vmem:[#allocation8 + $0x498] sm:$0xff]   ;;  %v6350_v1 = vld [vmem:[#allocation8 + $0x460] sm:$0xff]   ;;  %v6356_v20 = vld [vmem:[#allocation8 + $0x428] sm:$0xff]  }
 0x24b   :  { %v2532_v41 = vmax.f32 %v2179_v25, 0.0  ;;  %v2534_v42 = vmax.f32 %v2222_v30, 0.0  ;;  %v6352_v5 = vld [vmem:[#allocation8 + $0x420] sm:$0xff]   ;;  %v439_v11 = vrot.slane %v6823_v56, %v6768_v28  ;;  %v447_v39 = vrot.slane %v6823_v56, %v6771_v29  ;;  %v6357_v21 = vld [vmem:[#allocation8 + $0x4a8] sm:$0xff]   ;;  %v6358_v22 = vld [vmem:[#allocation8 + $0x470] sm:$0xff]  }
 0x24c   :  { %v2533_v16 = vmax.f32 %v2181_v0, 0.0  ;;  %v2535_v17 = vmax.f32 %v2224_v15, 0.0  ;;  %5988 = vmatpush3.bf16.msra.mxu0 %v6328_v31  ;;  %v6353_v6 = vld [vmem:[#allocation8 + $0x4a0] sm:$0xff]   ;;  %v443_v18 = vrot.slane %v6823_v56, %v6774_v32  ;;  %v6359_v31 = vld [vmem:[#allocation8 + $0x4f0] sm:$0xff]  }
 0x24d   :  { %v6833_v46 = vpack.c.bf16 %v2532_v41, %v2500_v4  ;;  %v6835_v47 = vpack.c.bf16 %v2534_v42, %v2502_v40  ;;  %6010 = vmatpush3.bf16.msra.mxu1 %v6329_v36  ;;  %5989 = vmatprep.subr.bf16.mxu0 %v6330_v37  ;;  %v6361_v42 = vld [vmem:[#allocation8 + $0x4b0] sm:$0xff]  }
 0x24e   :  { %v2565_v50 = vpack.c.bf16 %v2533_v16, %v2501_v43  ;;  %v2567_v51 = vpack.c.bf16 %v2535_v17, %v2503_v44  ;;  %6011 = vmatprep.subr.bf16.mxu1 %v6331_v3  ;;  %v6360_v3 = vld [vmem:[#allocation8 + $0x430] sm:$0xff]   ;;  %v6362_v43 = vld [vmem:[#allocation8 + $0x478] sm:$0xff]  }
 0x24f   :  { %v6363_v17 = vld [vmem:[#allocation8 + $0x4f8] sm:$0xff]  }
 0x250   :  { %5990 = vmatpush3.bf16.msra.mxu0 %v6332_v45 }
 0x251   :  { %6012 = vmatpush3.bf16.msra.mxu1 %v6333_v48  ;;  %6019 = vmatprep.subr.bf16.mxu0 %v6334_v49 }
 0x252   :  { %6041 = vmatprep.subr.bf16.mxu1 %v6335_v52 }
 0x253   :  { %4914 = vmatmul.mubr.bf16.vlgmr.msra.gmra.mrb[44].mxu0 %v6817_v38  ;;  %v6347_v38 = vld [vmem:[#allocation8 + $0x4d8] sm:$0xff]  }
 0x254   :  { %4955 = vmatmul.mubr.bf16.vlgmr.msra.gmra.mrb[44].mxu1 %v6819_v62  ;;  %6020 = vmatpush3.bf16.msra.mxu0 %v6336_v26  ;;  %v6348_v62 = vld [vmem:[#allocation8 + $0x418] sm:$0xff]  }
 0x255   :  { %4995 = vmatprep.mubr.bf16.mxu0 %v2565_v50  ;;  %6042 = vmatpush3.bf16.msra.mxu1 %v6337_v27 }
 0x256   :  { %5036 = vmatprep.mubr.bf16.mxu1 %v2567_v51  ;;  %6021 = vmatprep.subr.bf16.mxu0 %v6338_v12  ;;  %v6364_v12 = vld [vmem:[#allocation8 + $0x438] sm:$0xff]  }
 0x257   :  { %6043 = vmatprep.subr.bf16.mxu1 %v6339_v53 }
 0x258   :  { %6022 = vmatpush3.bf16.msra.mxu0 %v6340_v54 }
 0x259   :  { %6044 = vmatpush3.bf16.msra.mxu1 %v6341_v55  ;;  %6023 = vmatprep.subr.bf16.mxu0 %v6342_v57  ;;  %v6365_v55 = vld [vmem:[#allocation8 + $0x4b8] sm:$0xff]   ;;  %v6366_v57 = vld [vmem:[#allocation8 + $0x540] sm:$0xff]  }
 0x25a   :  { %6045 = vmatprep.subr.bf16.mxu1 %v6343_v58 }
 0x25c   :  { %6024 = vmatpush3.bf16.msra.mxu0 %v6344_v59 }
 0x25d   :  { %6046 = vmatpush3.bf16.msra.mxu1 %v6345_v60  ;;  %6025 = vmatprep.subr.bf16.mxu0 %v6346_v61  ;;  %v6367_v60 = vld [vmem:[#allocation8 + $0x5c0] sm:$0xff]  }
 0x25e   :  { %6047 = vmatprep.subr.bf16.mxu1 %v6347_v38  ;;  %v6368_v61 = vld [vmem:[#allocation8 + $0x500] sm:$0xff]  }
 0x25f   :  { %v6369_v38 = vld [vmem:[#allocation8 + $0x580] sm:$0xff]  }
 0x260   :  { %6026 = vmatpush3.bf16.msra.mxu0 %v6348_v62  ;;  %v6370_v62 = vld [vmem:[#allocation8 + $0x548] sm:$0xff]  }
 0x261   :  { %6048 = vmatpush3.bf16.msra.mxu1 %v6349_v63  ;;  %6027 = vmatprep.subr.bf16.mxu0 %v6350_v1  ;;  %v6371_v63 = vld [vmem:[#allocation8 + $0x5c8] sm:$0xff]  }
 0x262   :  { %6049 = vmatprep.subr.bf16.mxu1 %v6351_v2  ;;  %v6372_v1 = vld [vmem:[#allocation8 + $0x508] sm:$0xff]  }
 0x263   :  { %v6373_v2 = vld [vmem:[#allocation8 + $0x588] sm:$0xff]  }
 0x264   :  { %6028 = vmatpush3.bf16.msra.mxu0 %v6352_v5  ;;  %v6374_v5 = vld [vmem:[#allocation8 + $0x550] sm:$0xff]  }
 0x265   :  { %6050 = vmatpush3.bf16.msra.mxu1 %v6353_v6  ;;  %6029 = vmatprep.subr.bf16.mxu0 %v6354_v7  ;;  %v6375_v6 = vld [vmem:[#allocation8 + $0x5d0] sm:$0xff]  }
 0x266   :  { %v2260_v23 = vpop.f32.mrb[20].mxu0  ;;  %v2303_v24 = vpop.f32.mrb[20].mxu1  ;;  %6051 = vmatprep.subr.bf16.mxu1 %v6355_v10  ;;  %v6376_v7 = vld [vmem:[#allocation8 + $0x510] sm:$0xff]  }
 0x267   :  { %v2261_v25 = vadd.f32 %v2260_v23, %v439_v11  ;;  %v2304_v30 = vadd.f32 %v2303_v24, %v447_v39  ;;  %v2262_v34 = vpop.f32.mrb[21].mxu0  ;;  %v2305_v35 = vpop.f32.mrb[21].mxu1  ;;  %v6377_v10 = vld [vmem:[#allocation8 + $0x590] sm:$0xff]   ;;  %v6386_v23 = vld [vmem:[#allocation8 + $0x568] sm:$0xff]  }
 0x268   :  { %v2263_v36 = vadd.f32 %v2262_v34, %v443_v18  ;;  %v2306_v37 = vadd.f32 %v2305_v35, %v451_v19  ;;  %v2264_v0 = vpop.f32.mrb[22].mxu0  ;;  %v2307_v15 = vpop.f32.mrb[22].mxu1  ;;  %6030 = vmatpush3.bf16.msra.mxu0 %v6356_v20  ;;  %v6384_v20 = vld [vmem:[#allocation8 + $0x520] sm:$0xff]   ;;  %v6387_v24 = vld [vmem:[#allocation8 + $0x5e8] sm:$0xff]  }
 0x269   :  { %v2265_v56 = vadd.f32 %v2264_v0, %v439_v11  ;;  %v2308_v4 = vadd.f32 %v2307_v15, %v447_v39  ;;  %6052 = vmatpush3.bf16.msra.mxu1 %v6357_v21  ;;  %v2266_v40 = vpop.f32.mrb[23].mxu0  ;;  %v2309_v41 = vpop.f32.mrb[23].mxu1  ;;  %6031 = vmatprep.subr.bf16.mxu0 %v6358_v22  ;;  %v2504_v45 = vmax.f32 %v2261_v25, 0.0  ;;  %v2506_v48 = vmax.f32 %v2304_v30, 0.0  ;;  %v6378_v11 = vld [vmem:[#allocation8 + $0x558] sm:$0xff]   ;;  %v6385_v22 = vld [vmem:[#allocation8 + $0x5a0] sm:$0xff]  }
 0x26a   :  { %v2267_v44 = vadd.f32 %v2266_v40, %v443_v18  ;;  %v2310_v16 = vadd.f32 %v2309_v41, %v451_v19  ;;  %6053 = vmatprep.subr.bf16.mxu1 %v6359_v31  ;;  %v2505_v51 = vmax.f32 %v2263_v36, 0.0  ;;  %v2507_v52 = vmax.f32 %v2306_v37, 0.0  ;;  %v6381_v39 = vld [vmem:[#allocation8 + $0x598] sm:$0xff]   ;;  %v6382_v18 = vld [vmem:[#allocation8 + $0x560] sm:$0xff]   ;;  %v6388_v35 = vld [vmem:[#allocation8 + $0x528] sm:$0xff]  }
 0x26b   :  { %v2536_v49 = vmax.f32 %v2265_v56, 0.0  ;;  %v2538_v50 = vmax.f32 %v2308_v4, 0.0  ;;  %v6383_v19 = vld [vmem:[#allocation8 + $0x5e0] sm:$0xff]   ;;  %v6853_v21 = vld [vmem:[#allocation7 + $0x18] sm:$0xff]  ;;  %v6389_v36 = vld [vmem:[#allocation8 + $0x5a8] sm:$0xff]  }
 0x26c   :  { %v2537_v26 = vmax.f32 %v2267_v44, 0.0  ;;  %v2539_v27 = vmax.f32 %v2310_v16, 0.0  ;;  %6032 = vmatpush3.bf16.msra.mxu0 %v6360_v3  ;;  %v455_v31 = vrot.slane %v6853_v21, %v6740_v8  ;;  %v463_v25 = vrot.slane %v6853_v21, %v6743_v9  ;;  %v6390_v37 = vld [vmem:[#allocation8 + $0x570] sm:$0xff]  }
 0x26d   :  { %v6847_v53 = vpack.c.bf16 %v2536_v49, %v2504_v45  ;;  %v6849_v54 = vpack.c.bf16 %v2538_v50, %v2506_v48  ;;  %6054 = vmatpush3.bf16.msra.mxu1 %v6361_v42  ;;  %6033 = vmatprep.subr.bf16.mxu0 %v6362_v43  ;;  %v459_v30 = vrot.slane %v6853_v21, %v6748_v13  ;;  %v6391_v3 = vld [vmem:[#allocation8 + $0x5f0] sm:$0xff]   ;;  %v6394_v48 = vld [vmem:[#allocation8 + $0x578] sm:$0xff]  }
 0x26e   :  { %v2569_v58 = vpack.c.bf16 %v2537_v26, %v2505_v51  ;;  %v2571_v59 = vpack.c.bf16 %v2539_v27, %v2507_v52  ;;  %6055 = vmatprep.subr.bf16.mxu1 %v6363_v17  ;;  %v467_v34 = vrot.slane %v6853_v21, %v6751_v14  ;;  %v6392_v43 = vld [vmem:[#allocation8 + $0x530] sm:$0xff]   ;;  %v6395_v51 = vld [vmem:[#allocation8 + $0x5f8] sm:$0xff]  }
 0x26f   :  { %v6393_v45 = vld [vmem:[#allocation8 + $0x5b0] sm:$0xff]  }
 0x270   :  { %6034 = vmatpush3.bf16.msra.mxu0 %v6364_v12 }
 0x271   :  { %6056 = vmatpush3.bf16.msra.mxu1 %v6365_v55  ;;  %6063 = vmatprep.subr.bf16.mxu0 %v6366_v57 }
 0x272   :  { %6085 = vmatprep.subr.bf16.mxu1 %v6367_v60  ;;  %v6396_v60 = vld [vmem:[#allocation8 + $0x538] sm:$0xff]  }
 0x273   :  { %4996 = vmatmul.mubr.bf16.vlgmr.msra.gmra.mrb[48].mxu0 %v6833_v46  ;;  %v6379_v46 = vld [vmem:[#allocation8 + $0x5d8] sm:$0xff]  }
 0x274   :  { %5037 = vmatmul.mubr.bf16.vlgmr.msra.gmra.mrb[48].mxu1 %v6835_v47  ;;  %6064 = vmatpush3.bf16.msra.mxu0 %v6368_v61  ;;  %v6380_v47 = vld [vmem:[#allocation8 + $0x518] sm:$0xff]  }
 0x275   :  { %5077 = vmatprep.mubr.bf16.mxu0 %v2569_v58  ;;  %6086 = vmatpush3.bf16.msra.mxu1 %v6369_v38 }
 0x276   :  { %5118 = vmatprep.mubr.bf16.mxu1 %v2571_v59  ;;  %6065 = vmatprep.subr.bf16.mxu0 %v6370_v62  ;;  %v6397_v62 = vld [vmem:[#allocation8 + $0x5b8] sm:$0xff]  }
 0x277   :  { %6087 = vmatprep.subr.bf16.mxu1 %v6371_v63  ;;  %v6398_v63 = vld [vmem:[#allocation8 + $0x640] sm:$0xff]  }
 0x278   :  { %6066 = vmatpush3.bf16.msra.mxu0 %v6372_v1 }
 0x279   :  { %6088 = vmatpush3.bf16.msra.mxu1 %v6373_v2  ;;  %6067 = vmatprep.subr.bf16.mxu0 %v6374_v5  ;;  %v6399_v5 = vld [vmem:[#allocation8 + $0x6c0] sm:$0xff]  }
 0x27a   :  { %6089 = vmatprep.subr.bf16.mxu1 %v6375_v6  ;;  %v6400_v6 = vld [vmem:[#allocation8 + $0x600] sm:$0xff]  }
 0x27c   :  { %6068 = vmatpush3.bf16.msra.mxu0 %v6376_v7  ;;  %v6401_v7 = vld [vmem:[#allocation8 + $0x680] sm:$0xff]  }
 0x27d   :  { %6090 = vmatpush3.bf16.msra.mxu1 %v6377_v10  ;;  %6069 = vmatprep.subr.bf16.mxu0 %v6378_v11  ;;  %v6402_v10 = vld [vmem:[#allocation8 + $0x648] sm:$0xff]  }
 0x27e   :  { %6091 = vmatprep.subr.bf16.mxu1 %v6379_v46  ;;  %v6403_v11 = vld [vmem:[#allocation8 + $0x6c8] sm:$0xff]  }
 0x27f   :  { %v6404_v46 = vld [vmem:[#allocation8 + $0x608] sm:$0xff]  }
 0x280   :  { %6070 = vmatpush3.bf16.msra.mxu0 %v6380_v47  ;;  %v6405_v47 = vld [vmem:[#allocation8 + $0x688] sm:$0xff]  }
 0x281   :  { %6092 = vmatpush3.bf16.msra.mxu1 %v6381_v39  ;;  %6071 = vmatprep.subr.bf16.mxu0 %v6382_v18  ;;  %v6406_v39 = vld [vmem:[#allocation8 + $0x650] sm:$0xff]  }
 0x282   :  { %6093 = vmatprep.subr.bf16.mxu1 %v6383_v19  ;;  %v6407_v18 = vld [vmem:[#allocation8 + $0x6d0] sm:$0xff]  }
 0x283   :  { %v6408_v19 = vld [vmem:[#allocation8 + $0x610] sm:$0xff]  }
 0x284   :  { %6072 = vmatpush3.bf16.msra.mxu0 %v6384_v20  ;;  %v6409_v20 = vld [vmem:[#allocation8 + $0x690] sm:$0xff]  }
 0x285   :  { %6094 = vmatpush3.bf16.msra.mxu1 %v6385_v22  ;;  %6073 = vmatprep.subr.bf16.mxu0 %v6386_v23  ;;  %v6410_v22 = vld [vmem:[#allocation8 + $0x658] sm:$0xff]  }
 0x286   :  { %v2346_v0 = vpop.f32.mrb[24].mxu0  ;;  %v2389_v15 = vpop.f32.mrb[24].mxu1  ;;  %6095 = vmatprep.subr.bf16.mxu1 %v6387_v24  ;;  %v6413_v23 = vld [vmem:[#allocation8 + $0x698] sm:$0xff]   ;;  %v6414_v24 = vld [vmem:[#allocation8 + $0x660] sm:$0xff]  }
 0x287   :  { %v2347_v8 = vadd.f32 %v2346_v0, %v455_v31  ;;  %v2390_v56 = vadd.f32 %v2389_v15, %v463_v25  ;;  %v2348_v4 = vpop.f32.mrb[25].mxu0  ;;  %v2391_v9 = vpop.f32.mrb[25].mxu1  ;;  %v475_v0 = vrot.slane %v6853_v21, %v6774_v32  ;;  %v483_v15 = vrot.slane %v6853_v21, %v6777_v33 }
 0x288   :  { %v2349_v40 = vadd.f32 %v2348_v4, %v459_v30  ;;  %v2392_v41 = vadd.f32 %v2391_v9, %v467_v34  ;;  %v2350_v42 = vpop.f32.mrb[26].mxu0  ;;  %v2393_v13 = vpop.f32.mrb[26].mxu1  ;;  %6074 = vmatpush3.bf16.msra.mxu0 %v6388_v35  ;;  %v6419_v35 = vld [vmem:[#allocation8 + $0x6e8] sm:$0xff]  }
 0x289   :  { %v2351_v14 = vadd.f32 %v2350_v42, %v455_v31  ;;  %v2394_v44 = vadd.f32 %v2393_v13, %v463_v25  ;;  %6096 = vmatpush3.bf16.msra.mxu1 %v6389_v36  ;;  %v2352_v16 = vpop.f32.mrb[27].mxu0  ;;  %v2395_v17 = vpop.f32.mrb[27].mxu1  ;;  %6075 = vmatprep.subr.bf16.mxu0 %v6390_v37  ;;  %v2508_v52 = vmax.f32 %v2347_v8, 0.0  ;;  %v2510_v26 = vmax.f32 %v2390_v56, 0.0  ;;  %v6415_v31 = vld [vmem:[#allocation8 + $0x6e0] sm:$0xff]   ;;  %v6421_v8 = vld [vmem:[#allocation8 + $0x6a8] sm:$0xff]  }
 0x28a   :  { %v2353_v49 = vadd.f32 %v2352_v16, %v459_v30  ;;  %v2396_v50 = vadd.f32 %v2395_v17, %v467_v34  ;;  %6097 = vmatprep.subr.bf16.mxu1 %v6391_v3  ;;  %v2509_v55 = vmax.f32 %v2349_v40, 0.0  ;;  %v2511_v57 = vmax.f32 %v2392_v41, 0.0  ;;  %v6416_v25 = vld [vmem:[#allocation8 + $0x620] sm:$0xff]   ;;  %v6418_v34 = vld [vmem:[#allocation8 + $0x668] sm:$0xff]   ;;  %v6422_v56 = vld [vmem:[#allocation8 + $0x670] sm:$0xff]  }
 0x28b   :  { %v2540_v27 = vmax.f32 %v2351_v14, 0.0  ;;  %v2542_v12 = vmax.f32 %v2394_v44, 0.0  ;;  %v6417_v30 = vld [vmem:[#allocation8 + $0x6a0] sm:$0xff]   ;;  %v471_v36 = vrot.slane %v6853_v21, %v6768_v28  ;;  %v479_v37 = vrot.slane %v6853_v21, %v6771_v29  ;;  %v6420_v3 = vld [vmem:[#allocation8 + $0x628] sm:$0xff]   ;;  %v6423_v40 = vld [vmem:[#allocation8 + $0x6f0] sm:$0xff]  }
 0x28c   :  { %v2541_v58 = vmax.f32 %v2353_v49, 0.0  ;;  %v2543_v59 = vmax.f32 %v2396_v50, 0.0  ;;  %6076 = vmatpush3.bf16.msra.mxu0 %v6392_v43  ;;  %v6424_v44 = vld [vmem:[#allocation8 + $0x630] sm:$0xff]  }
 0x28d   :  { %v6863_v61 = vpack.c.bf16 %v2540_v27, %v2508_v52  ;;  %v6865_v38 = vpack.c.bf16 %v2542_v12, %v2510_v26  ;;  %6098 = vmatpush3.bf16.msra.mxu1 %v6393_v45  ;;  %6077 = vmatprep.subr.bf16.mxu0 %v6394_v48  ;;  %v6425_v45 = vld [vmem:[#allocation8 + $0x6b0] sm:$0xff]   ;;  %v6426_v48 = vld [vmem:[#allocation8 + $0x678] sm:$0xff]  }
 0x28e   :  { %v2573_v1 = vpack.c.bf16 %v2541_v58, %v2509_v55  ;;  %v2575_v2 = vpack.c.bf16 %v2543_v59, %v2511_v57  ;;  %6099 = vmatprep.subr.bf16.mxu1 %v6395_v51  ;;  %v6427_v51 = vld [vmem:[#allocation8 + $0x6f8] sm:$0xff]  }
 0x290   :  { %6078 = vmatpush3.bf16.msra.mxu0 %v6396_v60  ;;  %v6428_v60 = vld [vmem:[#allocation8 + $0x638] sm:$0xff]  }
 0x291   :  { %6100 = vmatpush3.bf16.msra.mxu1 %v6397_v62  ;;  %6107 = vmatprep.subr.bf16.mxu0 %v6398_v63 }
 0x292   :  { %6129 = vmatprep.subr.bf16.mxu1 %v6399_v5 }
 0x293   :  { %5078 = vmatmul.mubr.bf16.vlgmr.msra.gmra.mrb[52].mxu0 %v6847_v53  ;;  %v6411_v53 = vld [vmem:[#allocation8 + $0x6d8] sm:$0xff]  }
 0x294   :  { %5119 = vmatmul.mubr.bf16.vlgmr.msra.gmra.mrb[52].mxu1 %v6849_v54  ;;  %6108 = vmatpush3.bf16.msra.mxu0 %v6400_v6  ;;  %v6412_v54 = vld [vmem:[#allocation8 + $0x618] sm:$0xff]  }
 0x295   :  { %5159 = vmatprep.mubr.bf16.mxu0 %v2573_v1  ;;  %6130 = vmatpush3.bf16.msra.mxu1 %v6401_v7  ;;  %v6429_v1 = vld [vmem:[#allocation8 + $0x6b8] sm:$0xff]   ;;  %v6431_v7 = vld [vmem:[#allocation8 + $0x7c0] sm:$0xff]  }
 0x296   :  { %5200 = vmatprep.mubr.bf16.mxu1 %v2575_v2  ;;  %6109 = vmatprep.subr.bf16.mxu0 %v6402_v10  ;;  %v6430_v2 = vld [vmem:[#allocation8 + $0x740] sm:$0xff]  }
 0x297   :  { %6131 = vmatprep.subr.bf16.mxu1 %v6403_v11  ;;  %v6432_v10 = vld [vmem:[#allocation8 + $0x700] sm:$0xff]  }
 0x298   :  { %6110 = vmatpush3.bf16.msra.mxu0 %v6404_v46  ;;  %v6433_v11 = vld [vmem:[#allocation8 + $0x780] sm:$0xff]   ;;  %v6434_v46 = vld [vmem:[#allocation8 + $0x748] sm:$0xff]  }
 0x299   :  { %6132 = vmatpush3.bf16.msra.mxu1 %v6405_v47  ;;  %6111 = vmatprep.subr.bf16.mxu0 %v6406_v39  ;;  %v6435_v47 = vld [vmem:[#allocation8 + $0x7c8] sm:$0xff]  }
 0x29a   :  { %6133 = vmatprep.subr.bf16.mxu1 %v6407_v18  ;;  %v6436_v39 = vld [vmem:[#allocation8 + $0x708] sm:$0xff]  }
 0x29b   :  { %v6437_v18 = vld [vmem:[#allocation8 + $0x788] sm:$0xff]  }
 0x29c   :  { %6112 = vmatpush3.bf16.msra.mxu0 %v6408_v19  ;;  %v6438_v19 = vld [vmem:[#allocation8 + $0x750] sm:$0xff]  }
 0x29d   :  { %6134 = vmatpush3.bf16.msra.mxu1 %v6409_v20  ;;  %6113 = vmatprep.subr.bf16.mxu0 %v6410_v22  ;;  %v6439_v20 = vld [vmem:[#allocation8 + $0x7d0] sm:$0xff]  }
 0x29e   :  { %6135 = vmatprep.subr.bf16.mxu1 %v6411_v53  ;;  %v6440_v22 = vld [vmem:[#allocation8 + $0x710] sm:$0xff]  }
 0x29f   :  { %v6441_v53 = vld [vmem:[#allocation8 + $0x790] sm:$0xff]  }
 0x2a0   :  { %6114 = vmatpush3.bf16.msra.mxu0 %v6412_v54  ;;  %v6442_v54 = vld [vmem:[#allocation8 + $0x758] sm:$0xff]  }
 0x2a1   :  { %6136 = vmatpush3.bf16.msra.mxu1 %v6413_v23  ;;  %6115 = vmatprep.subr.bf16.mxu0 %v6414_v24  ;;  %v6445_v23 = vld [vmem:[#allocation8 + $0x798] sm:$0xff]   ;;  %v6446_v24 = vld [vmem:[#allocation8 + $0x760] sm:$0xff]  }
 0x2a2   :  { %6137 = vmatprep.subr.bf16.mxu1 %v6415_v31  ;;  %v6447_v31 = vld [vmem:[#allocation8 + $0x7e0] sm:$0xff]  }
 0x2a4   :  { %6116 = vmatpush3.bf16.msra.mxu0 %v6416_v25  ;;  %v6448_v25 = vld [vmem:[#allocation8 + $0x720] sm:$0xff]  }
 0x2a5   :  { %6138 = vmatpush3.bf16.msra.mxu1 %v6417_v30  ;;  %6117 = vmatprep.subr.bf16.mxu0 %v6418_v34  ;;  %v6449_v30 = vld [vmem:[#allocation8 + $0x7a0] sm:$0xff]   ;;  %v6450_v34 = vld [vmem:[#allocation8 + $0x768] sm:$0xff]  }
 0x2a6   :  { %v2432_v4 = vpop.f32.mrb[28].mxu0  ;;  %v2475_v9 = vpop.f32.mrb[28].mxu1  ;;  %6139 = vmatprep.subr.bf16.mxu1 %v6419_v35  ;;  %v6451_v35 = vld [vmem:[#allocation8 + $0x7e8] sm:$0xff]  }
 0x2a7   :  { %v2433_v28 = vadd.f32 %v2432_v4, %v471_v36  ;;  %v2476_v41 = vadd.f32 %v2475_v9, %v479_v37  ;;  %v2434_v42 = vpop.f32.mrb[29].mxu0  ;;  %v2477_v29 = vpop.f32.mrb[29].mxu1 }
 0x2a8   :  { %v2435_v13 = vadd.f32 %v2434_v42, %v475_v0  ;;  %v2478_v43 = vadd.f32 %v2477_v29, %v483_v15  ;;  %v2436_v14 = vpop.f32.mrb[30].mxu0  ;;  %v2479_v32 = vpop.f32.mrb[30].mxu1  ;;  %6118 = vmatpush3.bf16.msra.mxu0 %v6420_v3  ;;  %v6455_v3 = vld [vmem:[#allocation8 + $0x7f0] sm:$0xff]  }
 0x2a9   :  { %v2437_v33 = vadd.f32 %v2436_v14, %v471_v36  ;;  %v2480_v21 = vadd.f32 %v2479_v32, %v479_v37  ;;  %6140 = vmatpush3.bf16.msra.mxu1 %v6421_v8  ;;  %v2438_v16 = vpop.f32.mrb[31].mxu0  ;;  %v2481_v17 = vpop.f32.mrb[31].mxu1  ;;  %6119 = vmatprep.subr.bf16.mxu0 %v6422_v56  ;;  %v2512_v52 = vmax.f32 %v2433_v28, 0.0  ;;  %v2514_v26 = vmax.f32 %v2476_v41, 0.0  ;;  %v6452_v36 = vld [vmem:[#allocation8 + $0x728] sm:$0xff]   ;;  %v6456_v41 = vld [vmem:[#allocation8 + $0x730] sm:$0xff]  }
 0x2aa   :  { %v2439_v49 = vadd.f32 %v2438_v16, %v475_v0  ;;  %v2482_v50 = vadd.f32 %v2481_v17, %v483_v15  ;;  %6141 = vmatprep.subr.bf16.mxu1 %v6423_v40  ;;  %v2513_v55 = vmax.f32 %v2435_v13, 0.0  ;;  %v2515_v57 = vmax.f32 %v2478_v43, 0.0  ;;  %v6453_v37 = vld [vmem:[#allocation8 + $0x7a8] sm:$0xff]   ;;  %v6454_v0 = vld [vmem:[#allocation8 + $0x770] sm:$0xff]   ;;  %v5582_v56 = vld [vmem:[%s6906_s4] ss:$0 sm:$0xff] }
 0x2ab   :  { %v2544_v27 = vmax.f32 %v2437_v33, 0.0  ;;  %v2546_v12 = vmax.f32 %v2480_v21, 0.0  ;;  %v6457_v43 = vld [vmem:[#allocation8 + $0x7b0] sm:$0xff]   ;;  %v6458_v14 = vld [vmem:[#allocation8 + $0x778] sm:$0xff]   ;;  %s6601_s4 = smov [#allocation10]  }
 0x2ac   :  { %v2545_v58 = vmax.f32 %v2439_v49, 0.0  ;;  %v2547_v59 = vmax.f32 %v2482_v50, 0.0  ;;  %6120 = vmatpush3.bf16.msra.mxu0 %v6424_v44  ;;  %v6459_v21 = vld [vmem:[#allocation8 + $0x7f8] sm:$0xff]   ;;  %s5312_s17 = sshll.u32 %s6601_s4, 4  ;;  %s5313_s17 = int_to_ptr.vmem [resolvable:$true] %s5312_s17 }
 0x2ad   :  { %v6877_v62 = vpack.c.bf16 %v2544_v27, %v2512_v52  ;;  %v6879_v63 = vpack.c.bf16 %v2546_v12, %v2514_v26  ;;  %6142 = vmatpush3.bf16.msra.mxu1 %v6425_v45  ;;  %6121 = vmatprep.subr.bf16.mxu0 %v6426_v48  ;;  %v6460_v48 = vld [vmem:[#allocation8 + $0x738] sm:$0xff]   ;;  %s6562_s19 = scalar_lea.vmem %s5313_s17, 256  ;;  %p6567_p5 = scmp.lt.s32.totalorder %s5313_s17, %s5313_s17 }
 0x2ae   :  { %v2577_v5 = vpack.c.bf16 %v2545_v58, %v2513_v55  ;;  %v2579_v6 = vpack.c.bf16 %v2547_v59, %v2515_v57  ;;  %6143 = vmatprep.subr.bf16.mxu1 %v6427_v51  ;;  %v6461_v49 = vld [vmem:[#allocation8 + $0x7b8] sm:$0xff]   ;;  %p6563_p4 = scmp.ne.s32.totalorder %s5313_s17, %s6562_s19  ;;  %p6568_p6 = scmp.lt.s32.totalorder %s6562_s19, %s6562_s19 }
 0x2b0   :  { %6122 = vmatpush3.bf16.msra.mxu0 %v6428_v60  ;;  %p6569_p7 = por %p6568_p6, %p6567_p5 }
 0x2b1   :  { %6144 = vmatpush3.bf16.msra.mxu1 %v6429_v1  ;;  %6151 = vmatprep.subr.bf16.mxu0 %v6430_v2 }
 0x2b2   :  { %6173 = vmatprep.subr.bf16.mxu1 %v6431_v7  ;;  %p6570_p8 = pnand %p6569_p7, %p6563_p4 }
 0x2b3   :  { %5160 = vmatmul.mubr.bf16.vlgmr.msra.gmra.mrb[56].mxu0 %v6863_v61  ;;  %v6443_v61 = vld [vmem:[#allocation8 + $0x7d8] sm:$0xff]  }
 0x2b4   :  { %5201 = vmatmul.mubr.bf16.vlgmr.msra.gmra.mrb[56].mxu1 %v6865_v38  ;;  %6152 = vmatpush3.bf16.msra.mxu0 %v6432_v10  ;;  %v6444_v38 = vld [vmem:[#allocation8 + $0x718] sm:$0xff]  }
 0x2b5   :  { %5241 = vmatprep.mubr.bf16.mxu0 %v2577_v5  ;;  %6174 = vmatpush3.bf16.msra.mxu1 %v6433_v11 }
 0x2b6   :  { %5282 = vmatprep.mubr.bf16.mxu1 %v2579_v6  ;;  %6153 = vmatprep.subr.bf16.mxu0 %v6434_v46 }
 0x2b7   :  { %6175 = vmatprep.subr.bf16.mxu1 %v6435_v47 }
 0x2b8   :  { %6154 = vmatpush3.bf16.msra.mxu0 %v6436_v39 }
 0x2b9   :  { %6176 = vmatpush3.bf16.msra.mxu1 %v6437_v18  ;;  %6155 = vmatprep.subr.bf16.mxu0 %v6438_v19 }
 0x2ba   :  { %6177 = vmatprep.subr.bf16.mxu1 %v6439_v20 }
 0x2bc   :  { %6156 = vmatpush3.bf16.msra.mxu0 %v6440_v22 }
 0x2bd   :  { %6178 = vmatpush3.bf16.msra.mxu1 %v6441_v53  ;;  %6157 = vmatprep.subr.bf16.mxu0 %v6442_v54 }
 0x2be   :  { %6179 = vmatprep.subr.bf16.mxu1 %v6443_v61 }
 0x2c0   :  { %6158 = vmatpush3.bf16.msra.mxu0 %v6444_v38 }
 0x2c1   :  { %6180 = vmatpush3.bf16.msra.mxu1 %v6445_v23  ;;  %6159 = vmatprep.subr.bf16.mxu0 %v6446_v24 }
 0x2c2   :  { %6181 = vmatprep.subr.bf16.mxu1 %v6447_v31 }
 0x2c4   :  { %6160 = vmatpush3.bf16.msra.mxu0 %v6448_v25 }
 0x2c5   :  { %6182 = vmatpush3.bf16.msra.mxu1 %v6449_v30  ;;  %6161 = vmatprep.subr.bf16.mxu0 %v6450_v34 }
 0x2c6   :  { %v5859_v15 = vpop.f32.mrb[32].mxu0  ;;  %6183 = vmatprep.subr.bf16.mxu1 %v6451_v35 }
 0x2c7   :  { %v5881_v8 = vpop.f32.mrb[32].mxu1  ;;  %v5860_v4 = vpop.f32.mrb[33].mxu0 }
 0x2c8   :  { %v5861_v9 = vadd.f32 %v5860_v4, %v5859_v15  ;;  %v5882_v40 = vpop.f32.mrb[33].mxu1  ;;  %v5862_v28 = vpop.f32.mrb[34].mxu0  ;;  %6162 = vmatpush3.bf16.msra.mxu0 %v6452_v36 }
 0x2c9   :  { %v5883_v42 = vadd.f32 %v5882_v40, %v5881_v8  ;;  %v5884_v29 = vpop.f32.mrb[34].mxu1  ;;  %6184 = vmatpush3.bf16.msra.mxu1 %v6453_v37  ;;  %v5863_v13 = vpop.f32.mrb[35].mxu0  ;;  %6163 = vmatprep.subr.bf16.mxu0 %v6454_v0 }
 0x2ca   :  { %v4670_v32 = vadd.f32 %v5861_v9, %v5582_v56  ;;  %v5864_v44 = vadd.f32 %v5863_v13, %v5862_v28  ;;  %v5885_v33 = vpop.f32.mrb[35].mxu1  ;;  %6185 = vmatprep.subr.bf16.mxu1 %v6455_v3 }
 0x2cb   :  { %v5886_v16 = vadd.f32 %v5885_v33, %v5884_v29 }
 0x2cc   :  { %v4711_v17 = vadd.f32 %v5883_v42, %v4670_v32  ;;  %v4673_v45 = vadd.f32 %v5864_v44, %v5582_v56  ;;  %6164 = vmatpush3.bf16.msra.mxu0 %v6456_v41 }
 0x2cd   :  { %6186 = vmatpush3.bf16.msra.mxu1 %v6457_v43  ;;  %6165 = vmatprep.subr.bf16.mxu0 %v6458_v14 }
 0x2ce   :  { %v4714_v50 = vadd.f32 %v5886_v16, %v4673_v45  ;;  %6187 = vmatprep.subr.bf16.mxu1 %v6459_v21 }
 0x2d0   :  { %6166 = vmatpush3.bf16.msra.mxu0 %v6460_v48 }
 0x2d1   :  { %6188 = vmatpush3.bf16.msra.mxu1 %v6461_v49 }
 0x2d3   :  { %5242 = vmatmul.mubr.bf16.vlgmr.msra.gmra.mrb[60].mxu0 %v6877_v62 }
 0x2d4   :  { %5283 = vmatmul.mubr.bf16.vlgmr.msra.gmra.mrb[60].mxu1 %v6879_v63 }
 0x2e6   :  { %v5903_v51 = vpop.f32.mrb[36].mxu0 }
 0x2e7   :  { %v5925_v52 = vpop.f32.mrb[36].mxu1  ;;  %v5904_v26 = vpop.f32.mrb[37].mxu0 }
 0x2e8   :  { %v5905_v27 = vadd.f32 %v5904_v26, %v5903_v51  ;;  %v5926_v12 = vpop.f32.mrb[37].mxu1  ;;  %v5906_v55 = vpop.f32.mrb[38].mxu0 }
 0x2e9   :  { %v5927_v57 = vadd.f32 %v5926_v12, %v5925_v52  ;;  %v5928_v58 = vpop.f32.mrb[38].mxu1  ;;  %v5907_v59 = vpop.f32.mrb[39].mxu0 }
 0x2ea   :  { %v4752_v60 = vadd.f32 %v5905_v27, %v4711_v17  ;;  %v5908_v1 = vadd.f32 %v5907_v59, %v5906_v55  ;;  %v5929_v2 = vpop.f32.mrb[39].mxu1 }
 0x2eb   :  { %v5930_v5 = vadd.f32 %v5929_v2, %v5928_v58 }
 0x2ec   :  { %v4793_v6 = vadd.f32 %v5927_v57, %v4752_v60  ;;  %v4755_v7 = vadd.f32 %v5908_v1, %v4714_v50 }
 0x2ee   :  { %v4796_v10 = vadd.f32 %v5930_v5, %v4755_v7 }
 0x306   :  { %v5947_v11 = vpop.f32.mrb[40].mxu0 }
 0x307   :  { %v5969_v62 = vpop.f32.mrb[40].mxu1  ;;  %v5948_v46 = vpop.f32.mrb[41].mxu0 }
 0x308   :  { %v5949_v63 = vadd.f32 %v5948_v46, %v5947_v11  ;;  %v5970_v47 = vpop.f32.mrb[41].mxu1  ;;  %v5950_v39 = vpop.f32.mrb[42].mxu0 }
 0x309   :  { %v5971_v18 = vadd.f32 %v5970_v47, %v5969_v62  ;;  %v5972_v19 = vpop.f32.mrb[42].mxu1  ;;  %v5951_v20 = vpop.f32.mrb[43].mxu0 }
 0x30a   :  { %v4834_v22 = vadd.f32 %v5949_v63, %v4793_v6  ;;  %v5952_v53 = vadd.f32 %v5951_v20, %v5950_v39  ;;  %v5973_v54 = vpop.f32.mrb[43].mxu1 }
 0x30b   :  { %v5974_v61 = vadd.f32 %v5973_v54, %v5972_v19 }
 0x30c   :  { %v4875_v38 = vadd.f32 %v5971_v18, %v4834_v22  ;;  %v4837_v23 = vadd.f32 %v5952_v53, %v4796_v10 }
 0x30e   :  { %v4878_v24 = vadd.f32 %v5974_v61, %v4837_v23 }
 0x326   :  { %v5991_v31 = vpop.f32.mrb[44].mxu0 }
 0x327   :  { %v6013_v25 = vpop.f32.mrb[44].mxu1  ;;  %v5992_v30 = vpop.f32.mrb[45].mxu0 }
 0x328   :  { %v5993_v34 = vadd.f32 %v5992_v30, %v5991_v31  ;;  %v6014_v35 = vpop.f32.mrb[45].mxu1  ;;  %v5994_v36 = vpop.f32.mrb[46].mxu0 }
 0x329   :  { %v6015_v37 = vadd.f32 %v6014_v35, %v6013_v25  ;;  %v6016_v0 = vpop.f32.mrb[46].mxu1  ;;  %v5995_v15 = vpop.f32.mrb[47].mxu0 }
 0x32a   :  { %v4916_v3 = vadd.f32 %v5993_v34, %v4875_v38  ;;  %v5996_v8 = vadd.f32 %v5995_v15, %v5994_v36  ;;  %v6017_v56 = vpop.f32.mrb[47].mxu1 }
 0x32b   :  { %v6018_v4 = vadd.f32 %v6017_v56, %v6016_v0 }
 0x32c   :  { %v4957_v9 = vadd.f32 %v6015_v37, %v4916_v3  ;;  %v4919_v40 = vadd.f32 %v5996_v8, %v4878_v24 }
 0x32e   :  { %v4960_v28 = vadd.f32 %v6018_v4, %v4919_v40 }
 0x346   :  { %v6035_v41 = vpop.f32.mrb[48].mxu0 }
 0x347   :  { %v6057_v42 = vpop.f32.mrb[48].mxu1  ;;  %v6036_v29 = vpop.f32.mrb[49].mxu0 }
 0x348   :  { %v6037_v13 = vadd.f32 %v6036_v29, %v6035_v41  ;;  %v6058_v43 = vpop.f32.mrb[49].mxu1  ;;  %v6038_v14 = vpop.f32.mrb[50].mxu0 }
 0x349   :  { %v6059_v32 = vadd.f32 %v6058_v43, %v6057_v42  ;;  %v6060_v44 = vpop.f32.mrb[50].mxu1  ;;  %v6039_v33 = vpop.f32.mrb[51].mxu0 }
 0x34a   :  { %v4998_v21 = vadd.f32 %v6037_v13, %v4957_v9  ;;  %v6040_v16 = vadd.f32 %v6039_v33, %v6038_v14  ;;  %v6061_v17 = vpop.f32.mrb[51].mxu1 }
 0x34b   :  { %v6062_v45 = vadd.f32 %v6061_v17, %v6060_v44 }
 0x34c   :  { %v5039_v48 = vadd.f32 %v6059_v32, %v4998_v21  ;;  %v5001_v49 = vadd.f32 %v6040_v16, %v4960_v28 }
 0x34e   :  { %v5042_v50 = vadd.f32 %v6062_v45, %v5001_v49 }
 0x366   :  { %v6079_v51 = vpop.f32.mrb[52].mxu0 }
 0x367   :  { %v6101_v52 = vpop.f32.mrb[52].mxu1  ;;  %v6080_v26 = vpop.f32.mrb[53].mxu0 }
 0x368   :  { %v6081_v27 = vadd.f32 %v6080_v26, %v6079_v51  ;;  %v6102_v12 = vpop.f32.mrb[53].mxu1  ;;  %v6082_v55 = vpop.f32.mrb[54].mxu0 }
 0x369   :  { %v6103_v57 = vadd.f32 %v6102_v12, %v6101_v52  ;;  %v6104_v58 = vpop.f32.mrb[54].mxu1  ;;  %v6083_v59 = vpop.f32.mrb[55].mxu0 }
 0x36a   :  { %v5080_v60 = vadd.f32 %v6081_v27, %v5039_v48  ;;  %v6084_v1 = vadd.f32 %v6083_v59, %v6082_v55  ;;  %v6105_v2 = vpop.f32.mrb[55].mxu1 }
 0x36b   :  { %v6106_v5 = vadd.f32 %v6105_v2, %v6104_v58 }
 0x36c   :  { %v5121_v6 = vadd.f32 %v6103_v57, %v5080_v60  ;;  %v5083_v7 = vadd.f32 %v6084_v1, %v5042_v50 }
 0x36e   :  { %v5124_v10 = vadd.f32 %v6106_v5, %v5083_v7 }
 0x386   :  { %v6123_v11 = vpop.f32.mrb[56].mxu0 }
 0x387   :  { %v6145_v62 = vpop.f32.mrb[56].mxu1  ;;  %v6124_v46 = vpop.f32.mrb[57].mxu0 }
 0x388   :  { %v6125_v63 = vadd.f32 %v6124_v46, %v6123_v11  ;;  %v6146_v47 = vpop.f32.mrb[57].mxu1  ;;  %v6126_v39 = vpop.f32.mrb[58].mxu0 }
 0x389   :  { %v6147_v18 = vadd.f32 %v6146_v47, %v6145_v62  ;;  %v6148_v19 = vpop.f32.mrb[58].mxu1  ;;  %v6127_v20 = vpop.f32.mrb[59].mxu0 }
 0x38a   :  { %v5162_v22 = vadd.f32 %v6125_v63, %v5121_v6  ;;  %v6128_v53 = vadd.f32 %v6127_v20, %v6126_v39  ;;  %v6149_v54 = vpop.f32.mrb[59].mxu1 }
 0x38b   :  { %v6150_v61 = vadd.f32 %v6149_v54, %v6148_v19 }
 0x38c   :  { %v5203_v38 = vadd.f32 %v6147_v18, %v5162_v22  ;;  %v5165_v23 = vadd.f32 %v6128_v53, %v5124_v10 }
 0x38e   :  { %v5206_v24 = vadd.f32 %v6150_v61, %v5165_v23 }
 0x3a6   :  { %v6167_v31 = vpop.f32.mrb[60].mxu0 }
 0x3a7   :  { %v6189_v25 = vpop.f32.mrb[60].mxu1  ;;  %v6168_v30 = vpop.f32.mrb[61].mxu0 }
 0x3a8   :  { %v6169_v34 = vadd.f32 %v6168_v30, %v6167_v31  ;;  %v6190_v35 = vpop.f32.mrb[61].mxu1  ;;  %v6170_v36 = vpop.f32.mrb[62].mxu0 }
 0x3a9   :  { %v6191_v37 = vadd.f32 %v6190_v35, %v6189_v25  ;;  %v6192_v0 = vpop.f32.mrb[62].mxu1  ;;  %v6171_v15 = vpop.f32.mrb[63].mxu0 }
 0x3aa   :  { %v5244_v3 = vadd.f32 %v6169_v34, %v5203_v38  ;;  %v6172_v8 = vadd.f32 %v6171_v15, %v6170_v36  ;;  %v6193_v56 = vpop.f32.mrb[63].mxu1 }
 0x3ab   :  { %v6194_v4 = vadd.f32 %v6193_v56, %v6192_v0 }
 0x3ac   :  { %v5285_v9 = vadd.f32 %v6191_v37, %v5244_v3  ;;  %v5247_v40 = vadd.f32 %v6172_v8, %v5206_v24 }
 0x3ae   :  { %6466 = vtanh.f32 %v5285_v9  ;;  %v5288_v28 = vadd.f32 %v6194_v4, %v5247_v40 }
 0x3b0   :  { %6468 = vtanh.f32 %v5288_v28 }
 0x3b8   :  { %v6467_v41 = vpop.eup %6466 }
 0x3b9   :  { %v5293_v42 = vmul.f32 %v6467_v41, %v6467_v41 }
 0x3ba   :  { %v6469_v29 = vpop.eup %6468 }
 0x3bb   :  { %5295 = vadd.xlane.f32.xlu1 %v5293_v42  ;;  %v5294_v13 = vmul.f32 %v6469_v29, %v6469_v29 }
 0x3bf   :  { %5297 = vadd.xlane.f32.xlu1 %v5294_v13 }
 0x448   :  { %v5296_v43 = vpop.xlane.xlu1 %5295 }
 0x449   :  { %v5299_v14 = vmax.f32 %v5296_v43, 1e-24 }
 0x44b   :  { %6470 = vrsqrt.f32 %v5299_v14 }
 0x44c   :  { %v5298_v32 = vpop.xlane.xlu1 %5297 }
 0x44d   :  { %v5300_v44 = vmax.f32 %v5298_v32, 1e-24 }
 0x44f   :  { %6472 = vrsqrt.f32 %v5300_v44 }
 0x455   :  { %v6471_v33 = vpop.eup %6470 }
 0x456   :  { %v5303_v21 = vmul.f32 %v6471_v33, %v6467_v41 }
 0x458   :  { %5305 = vst [vmem:[#allocation10] sm:$0xff] %v5303_v21 }
 0x459   :  { %v6473_v16 = vpop.eup %6472 }
 0x45a   :  { %v5304_v17 = vmul.f32 %v6473_v16, %v6469_v29 }
 0x45c   :  { %5306 = vst [vmem:[#allocation10 + $0x8] sm:$0xff] %v5304_v17 }
 0x45d   :  { %6573 = shalt.err (!%p6570_p8)
}
 0x45e   :  { %s6574_s22 = scalar_lea.hbm %s6907_s5, 256 }
 0x45f   :  { %p6575_p9 = scmp.ne.s32.totalorder %s6907_s5, %s6574_s22  ;;  %p6578_p10 = scmp.lt.u32.totalorder %s6574_s22, %s6907_s5 }
 0x461   :  { %p6580_p11 = pnand %p6578_p10, %p6575_p9 }
 0x463   :  { %6583 = shalt.err (!%p6580_p11)
}
 0x464   :  { %s6602_s27 = smov 8  }
 0x465   :  { %5318 = dma.vmem_to_hbm [thread:$0]  %s5313_s17, 256, %s6907_s5, [#allocation4], %s6594_s29, %s6594_s29, %s6602_s27  }
 0x466   :  { %6590 = dma.done.wait [#allocation4], 256  }
 0x467   :  { %6591 = vsyncadd [#allocation4], 4294967040 }
 0x468   :  { %5322 = vsyncpa [#allocation3], 1 }
 0x469   :  { %5323 = vsyncpa [#allocation6], 1 }
 0x46a   :  { %5324 = vsyncpa [#allocation9], 1 }
 0x46b   :  { %5325 = vsyncpa [#allocation4], 1 }

</bundles_post_ra>
